<compile_context>
chip_gen: v5e
topology: v5e:2x2
jax: 0.10.0
libtpu: 0.0.40
codegen_flags: <defaults>
</compile_context>

<pallas_src>
import math
import functools

import jax
import jax.numpy as jnp
from jax.experimental import pallas as pl
from jax.experimental.pallas import tpu as pltpu

SCALE = math.sqrt(0.5)
LANE = 128
_DN3 = (((2,), (0,)), ((), ()))   # (B, L, C) @ (C, N) -> (B, L, N)
_DN2 = (((1,), (0,)), ((), ()))   # (M, C)    @ (C, N) -> (M, N)


def _round_up(x, m):
    return (x + m - 1) // m * m


def _pad_to(x, shape):
    pads = [(0, t - s) for s, t in zip(x.shape, shape)]
    return jnp.pad(x, pads)


# ---------------------------------------------------------------------------
# Fused encoder stack kernel
#   grid = (num_layers,)  ["arbitrary": layer carry in VMEM scratch]
# ---------------------------------------------------------------------------
def _encoder_stack_kernel(emb_ref, e2h_w_ref, e2h_b_ref, h2e_w_ref, h2e_b_ref,
                          cw_ref, cb_ref,
                          conved_ref, combined_ref,
                          h_ref, xp_ref,
                          *, K, pad, L, HP):
    l = pl.program_id(0)
    nl = pl.num_programs(0)
    bf = jnp.bfloat16

    @pl.when(l == 0)
    def _():
        # conv_input = emb2hid(embedded); zero the padded conv buffer once.
        h_ref[...] = jax.lax.dot_general(
            emb_ref[...].astype(bf), e2h_w_ref[...], _DN3,
            preferred_element_type=jnp.float32) + e2h_b_ref[...]
        xp_ref[...] = jnp.zeros_like(xp_ref)

    x = h_ref[...]                                    # (B, L, HP) f32
    B = x.shape[0]
    xp_ref[:, pad:pad + L, :] = x                     # 'same' padding in VMEM

    acc = jnp.zeros((B, L, 2 * HP), jnp.float32)
    for k in range(K):                                # K taps -> MXU dots
        acc = acc + jax.lax.dot_general(
            xp_ref[:, k:k + L, :].astype(bf), cw_ref[k], _DN3,
            preferred_element_type=jnp.float32)
    acc = acc + cb_ref[...]

    glu = acc[:, :, :HP] * jax.nn.sigmoid(acc[:, :, HP:])
    h_new = (glu + x) * SCALE                         # residual (f32)
    h_ref[...] = h_new

    @pl.when(l == nl - 1)
    def _():
        conved_e = jax.lax.dot_general(
            h_new.astype(bf), h2e_w_ref[...], _DN3,
            preferred_element_type=jnp.float32) + h2e_b_ref[...]
        conved_ref[...] = conved_e
        combined_ref[...] = (conved_e + emb_ref[...]) * SCALE


def encoder_stack(embedded, e2h_w, e2h_b, h2e_w, h2e_b, conv_w, conv_b):
    B, S, EP = embedded.shape
    HP = e2h_w.shape[1]
    nl, K = conv_w.shape[0], conv_w.shape[1]
    pad = (K - 1) // 2
    c3 = lambda l: (0, 0, 0)
    c2 = lambda l: (0, 0)
    kern = functools.partial(_encoder_stack_kernel, K=K, pad=pad, L=S, HP=HP)
    return pl.pallas_call(
        kern,
        grid=(nl,),
        in_specs=[
            pl.BlockSpec((B, S, EP), c3),                              # embedded
            pl.BlockSpec((EP, HP), c2),                                # emb2hid w
            pl.BlockSpec((1, HP), c2),                                 # emb2hid b
            pl.BlockSpec((HP, EP), c2),                                # hid2emb w
            pl.BlockSpec((1, EP), c2),                                 # hid2emb b
            pl.BlockSpec((None, K, HP, 2 * HP), lambda l: (l, 0, 0, 0)),  # conv w
            pl.BlockSpec((None, 1, 2 * HP), lambda l: (l, 0, 0)),         # conv b
        ],
        out_specs=(pl.BlockSpec((B, S, EP), c3),
                   pl.BlockSpec((B, S, EP), c3)),
        out_shape=(jax.ShapeDtypeStruct((B, S, EP), jnp.float32),
                   jax.ShapeDtypeStruct((B, S, EP), jnp.float32)),
        scratch_shapes=[pltpu.VMEM((B, S, HP), jnp.float32),            # carry
                        pltpu.VMEM((B, S + K - 1, HP), jnp.float32)],   # padded x
        compiler_params=pltpu.CompilerParams(
            dimension_semantics=("arbitrary",)),
    )(embedded, e2h_w, e2h_b, h2e_w, h2e_b, conv_w, conv_b)


# ---------------------------------------------------------------------------
# Fused decoder stack kernel (causal conv + GLU + attention + residuals)
#   grid = (num_layers,)  ["arbitrary": layer carry in VMEM scratch]
# ---------------------------------------------------------------------------
def _decoder_stack_kernel(emb_ref, encC_ref, encB_ref,
                          e2h_w_ref, e2h_b_ref, cw_ref, cb_ref,
                          ah2e_w_ref, ah2e_b_ref, ae2h_w_ref, ae2h_b_ref,
                          h2e_w_ref, h2e_b_ref,
                          conved_ref, attn_ref,
                          h_ref, xp_ref,
                          *, K, L, HP):
    l = pl.program_id(0)
    nl = pl.num_programs(0)
    bf = jnp.bfloat16

    @pl.when(l == 0)
    def _():
        h_ref[...] = jax.lax.dot_general(
            emb_ref[...].astype(bf), e2h_w_ref[...], _DN3,
            preferred_element_type=jnp.float32) + e2h_b_ref[...]
        xp_ref[...] = jnp.zeros_like(xp_ref)

    x = h_ref[...]                                    # (B, T, HP) f32
    B = x.shape[0]
    xp_ref[:, K - 1:K - 1 + L, :] = x                 # causal left-padding

    acc = jnp.zeros((B, L, 2 * HP), jnp.float32)
    for k in range(K):
        acc = acc + jax.lax.dot_general(
            xp_ref[:, k:k + L, :].astype(bf), cw_ref[k], _DN3,
            preferred_element_type=jnp.float32)
    acc = acc + cb_ref[...]
    conved = acc[:, :, :HP] * jax.nn.sigmoid(acc[:, :, HP:])   # GLU

    # ---- attention (all in VMEM) ----
    conved_emb = jax.lax.dot_general(
        conved.astype(bf), ah2e_w_ref[...], _DN3,
        preferred_element_type=jnp.float32) + ah2e_b_ref[...]
    combined = (conved_emb + emb_ref[...]) * SCALE             # (B, T, EP)

    energy = jnp.einsum('bte,bse->bts', combined.astype(bf),
                        encC_ref[...].astype(bf),
                        preferred_element_type=jnp.float32)
    m = jnp.max(energy, axis=-1, keepdims=True)
    e = jnp.exp(energy - m)
    attn = e * pl.reciprocal(jnp.sum(e, axis=-1, keepdims=True), approx=True)

    attended = jnp.einsum('bts,bse->bte', attn.astype(bf),
                          encB_ref[...].astype(bf),
                          preferred_element_type=jnp.float32)
    attended_h = jax.lax.dot_general(
        attended.astype(bf), ae2h_w_ref[...], _DN3,
        preferred_element_type=jnp.float32) + ae2h_b_ref[...]

    conved2 = (conved + attended_h) * SCALE
    h_new = (conved2 + x) * SCALE
    h_ref[...] = h_new
    attn_ref[...] = attn          # last layer's attention is what is returned

    @pl.when(l == nl - 1)
    def _():
        conved_ref[...] = jax.lax.dot_general(
            h_new.astype(bf), h2e_w_ref[...], _DN3,
            preferred_element_type=jnp.float32) + h2e_b_ref[...]


def decoder_stack(embedded, enc_conved, enc_combined,
                  e2h_w, e2h_b, conv_w, conv_b,
                  ah2e_w, ah2e_b, ae2h_w, ae2h_b, h2e_w, h2e_b):
    B, T, EP = embedded.shape
    S = enc_conved.shape[1]
    HP = e2h_w.shape[1]
    nl, K = conv_w.shape[0], conv_w.shape[1]
    c3 = lambda l: (0, 0, 0)
    c2 = lambda l: (0, 0)
    kern = functools.partial(_decoder_stack_kernel, K=K, L=T, HP=HP)
    return pl.pallas_call(
        kern,
        grid=(nl,),
        in_specs=[
            pl.BlockSpec((B, T, EP), c3),                              # embedded
            pl.BlockSpec((B, S, EP), c3),                              # enc_conved
            pl.BlockSpec((B, S, EP), c3),                              # enc_combined
            pl.BlockSpec((EP, HP), c2),                                # emb2hid w
            pl.BlockSpec((1, HP), c2),                                 # emb2hid b
            pl.BlockSpec((None, K, HP, 2 * HP), lambda l: (l, 0, 0, 0)),  # conv w
            pl.BlockSpec((None, 1, 2 * HP), lambda l: (l, 0, 0)),         # conv b
            pl.BlockSpec((HP, EP), c2),                                # attn_hid2emb w
            pl.BlockSpec((1, EP), c2),                                 # attn_hid2emb b
            pl.BlockSpec((EP, HP), c2),                                # attn_emb2hid w
            pl.BlockSpec((1, HP), c2),                                 # attn_emb2hid b
            pl.BlockSpec((HP, EP), c2),                                # hid2emb w
            pl.BlockSpec((1, EP), c2),                                 # hid2emb b
        ],
        out_specs=(pl.BlockSpec((B, T, EP), c3),
                   pl.BlockSpec((B, T, S), c3)),
        out_shape=(jax.ShapeDtypeStruct((B, T, EP), jnp.float32),
                   jax.ShapeDtypeStruct((B, T, S), jnp.float32)),
        scratch_shapes=[pltpu.VMEM((B, T, HP), jnp.float32),            # carry
                        pltpu.VMEM((B, T + K - 1, HP), jnp.float32)],   # padded x
        compiler_params=pltpu.CompilerParams(
            dimension_semantics=("arbitrary",)),
    )(embedded, enc_conved, enc_combined, e2h_w, e2h_b, conv_w, conv_b,
      ah2e_w, ah2e_b, ae2h_w, ae2h_b, h2e_w, h2e_b)


# ---------------------------------------------------------------------------
# Vocab projection kernel, tiled over the (padded) vocab dim ("parallel")
# ---------------------------------------------------------------------------
def _out_proj_kernel(x_ref, w_ref, b_ref, o_ref):
    o_ref[...] = jax.lax.dot_general(
        x_ref[...].astype(jnp.bfloat16), w_ref[...], _DN2,
        preferred_element_type=jnp.float32) + b_ref[...]


def out_projection(x2, w, b, *, tile_n=512):
    M, EP = x2.shape
    VP = w.shape[1]
    tn = VP if VP <= tile_n else tile_n
    return pl.pallas_call(
        _out_proj_kernel,
        grid=(pl.cdiv(VP, tn),),
        in_specs=[pl.BlockSpec((M, EP), lambda j: (0, 0)),
                  pl.BlockSpec((EP, tn), lambda j: (0, j)),
                  pl.BlockSpec((1, tn), lambda j: (0, j))],
        out_specs=pl.BlockSpec((M, tn), lambda j: (0, j)),
        out_shape=jax.ShapeDtypeStruct((M, VP), jnp.float32),
        compiler_params=pltpu.CompilerParams(
            dimension_semantics=("parallel",)),
    )(x2, w, b)


# ---------------------------------------------------------------------------
# ConvS2S forward (host glue: embedding gathers + the three fused kernels)
# ---------------------------------------------------------------------------
def encoder_forward(p, src):
    S = src.shape[1]
    tok = jnp.take(p['enc_tok_emb'], src, axis=0)           # (B, S, EP)
    pos = p['enc_pos_emb'][:S][None]                         # (1, S, EP)
    embedded = tok + pos                                     # dropout = identity
    return encoder_stack(embedded,
                         p['enc_emb2hid_w'], p['enc_emb2hid_b'],
                         p['enc_hid2emb_w'], p['enc_hid2emb_b'],
                         p['enc_conv_w'], p['enc_conv_b'])


def decoder_forward(p, trg, enc_conved, enc_combined, *, trg_vocab):
    B, T = trg.shape
    tok = jnp.take(p['dec_tok_emb'], trg, axis=0)
    pos = p['dec_pos_emb'][:T][None]
    embedded = tok + pos
    dec_conved, attn = decoder_stack(
        embedded, enc_conved, enc_combined,
        p['dec_emb2hid_w'], p['dec_emb2hid_b'],
        p['dec_conv_w'], p['dec_conv_b'],
        p['attn_hid2emb_w'], p['attn_hid2emb_b'],
        p['attn_emb2hid_w'], p['attn_emb2hid_b'],
        p['dec_hid2emb_w'], p['dec_hid2emb_b'])
    EP = dec_conved.shape[-1]
    logits = out_projection(dec_conved.reshape(B * T, EP),
                            p['fc_out_w'], p['fc_out_b'])
    output = logits[:, :trg_vocab].reshape(B, T, trg_vocab)  # drop vocab padding
    return output, attn


def seq2seq_forward(p, src, trg, *, trg_vocab):
    enc_conved, enc_combined = encoder_forward(p, src)
    output, attn = decoder_forward(p, trg, enc_conved, enc_combined,
                                   trg_vocab=trg_vocab)
    return output, attn


# ---------------------------------------------------------------------------
# Deterministic parameter init (logical shapes follow the ConvS2S module)
# ---------------------------------------------------------------------------
def init_params(key, *, src_vocab, trg_vocab, emb_dim, hid_dim,
                enc_layers, dec_layers, kernel_size, max_len):
    keys = iter(jax.random.split(key, 64))

    def nrm(shape, scale=0.1):
        return jax.random.normal(next(keys), shape, jnp.float32) * scale

    p = {}
    p['enc_tok_emb'] = nrm((src_vocab, emb_dim))
    p['enc_pos_emb'] = nrm((max_len, emb_dim))
    p['enc_emb2hid_w'] = nrm((emb_dim, hid_dim))
    p['enc_emb2hid_b'] = nrm((hid_dim,))
    p['enc_hid2emb_w'] = nrm((hid_dim, emb_dim))
    p['enc_hid2emb_b'] = nrm((emb_dim,))
    p['enc_convs'] = [(nrm((kernel_size, hid_dim, 2 * hid_dim)),
                       nrm((2 * hid_dim,))) for _ in range(enc_layers)]

    p['dec_tok_emb'] = nrm((trg_vocab, emb_dim))
    p['dec_pos_emb'] = nrm((max_len, emb_dim))
    p['dec_emb2hid_w'] = nrm((emb_dim, hid_dim))
    p['dec_emb2hid_b'] = nrm((hid_dim,))
    p['dec_hid2emb_w'] = nrm((hid_dim, emb_dim))
    p['dec_hid2emb_b'] = nrm((emb_dim,))
    p['attn_hid2emb_w'] = nrm((hid_dim, emb_dim))
    p['attn_hid2emb_b'] = nrm((emb_dim,))
    p['attn_emb2hid_w'] = nrm((emb_dim, hid_dim))
    p['attn_emb2hid_b'] = nrm((hid_dim,))
    p['fc_out_w'] = nrm((emb_dim, trg_vocab))
    p['fc_out_b'] = nrm((trg_vocab,))
    p['dec_convs'] = [(nrm((kernel_size, hid_dim, 2 * hid_dim)),
                       nrm((2 * hid_dim,))) for _ in range(dec_layers)]
    return p


# ---------------------------------------------------------------------------
# One-time packing: zero-pad features to 128 lanes (GLU halves independently),
# stack per-layer conv weights, cast matmul weights to bf16 (biases stay f32).
# All padding is exact zeros, so the forward math is unchanged.
# ---------------------------------------------------------------------------
def pack_params(p, *, emb_dim, hid_dim, kernel_size):
    E, H, K = emb_dim, hid_dim, kernel_size
    EP, HP = _round_up(E, LANE), _round_up(H, LANE)
    bf = jnp.bfloat16

    def lin(w, b, r, c):
        return (_pad_to(w, (r, c)).astype(bf),
                _pad_to(b.reshape(1, -1), (1, c)).astype(jnp.float32))

    def convs(layers):
        ws, bs = [], []
        for w, b in layers:
            wa = _pad_to(w[:, :, :H], (K, HP, HP))
            wg = _pad_to(w[:, :, H:], (K, HP, HP))
            ws.append(jnp.concatenate([wa, wg], axis=-1))          # (K, HP, 2HP)
            ba = _pad_to(b[:H], (HP,))
            bg = _pad_to(b[H:], (HP,))
            bs.append(jnp.concatenate([ba, bg])[None, :])          # (1, 2HP)
        return (jnp.stack(ws).astype(bf),
                jnp.stack(bs).astype(jnp.float32))

    q = {}
    q['enc_tok_emb'] = _pad_to(p['enc_tok_emb'], (p['enc_tok_emb'].shape[0], EP))
    q['enc_pos_emb'] = _pad_to(p['enc_pos_emb'], (p['enc_pos_emb'].shape[0], EP))
    q['enc_emb2hid_w'], q['enc_emb2hid_b'] = lin(p['enc_emb2hid_w'], p['enc_emb2hid_b'], EP, HP)
    q['enc_hid2emb_w'], q['enc_hid2emb_b'] = lin(p['enc_hid2emb_w'], p['enc_hid2emb_b'], HP, EP)
    q['enc_conv_w'], q['enc_conv_b'] = convs(p['enc_convs'])

    q['dec_tok_emb'] = _pad_to(p['dec_tok_emb'], (p['dec_tok_emb'].shape[0], EP))
    q['dec_pos_emb'] = _pad_to(p['dec_pos_emb'], (p['dec_pos_emb'].shape[0], EP))
    q['dec_emb2hid_w'], q['dec_emb2hid_b'] = lin(p['dec_emb2hid_w'], p['dec_emb2hid_b'], EP, HP)
    q['dec_hid2emb_w'], q['dec_hid2emb_b'] = lin(p['dec_hid2emb_w'], p['dec_hid2emb_b'], HP, EP)
    q['attn_hid2emb_w'], q['attn_hid2emb_b'] = lin(p['attn_hid2emb_w'], p['attn_hid2emb_b'], HP, EP)
    q['attn_emb2hid_w'], q['attn_emb2hid_b'] = lin(p['attn_emb2hid_w'], p['attn_emb2hid_b'], EP, HP)
    q['dec_conv_w'], q['dec_conv_b'] = convs(p['dec_convs'])

    V = p['fc_out_w'].shape[1]
    VP = _round_up(V, LANE)
    q['fc_out_w'], q['fc_out_b'] = lin(p['fc_out_w'], p['fc_out_b'], EP, VP)
    return q


if __name__ == "__main__":
    B, S, T = 2, 8, 8
    EMB, HID, KS = 32, 32, 3
    SRC_VOCAB, TRG_VOCAB = 64, 96
    MAX_LEN = 50

    key = jax.random.PRNGKey(0)
    kp, ks, kt = jax.random.split(key, 3)
    raw = init_params(kp, src_vocab=SRC_VOCAB, trg_vocab=TRG_VOCAB,
                      emb_dim=EMB, hid_dim=HID, enc_layers=2, dec_layers=2,
                      kernel_size=KS, max_len=MAX_LEN)
    params = pack_params(raw, emb_dim=EMB, hid_dim=HID, kernel_size=KS)

    src = jax.random.randint(ks, (B, S), 0, SRC_VOCAB, dtype=jnp.int32)
    trg = jax.random.randint(kt, (B, T), 0, TRG_VOCAB, dtype=jnp.int32)

    fwd = jax.jit(functools.partial(seq2seq_forward, trg_vocab=TRG_VOCAB))
    output, attn = fwd(params, src, trg)
    jax.block_until_ready((output, attn))

    assert output.shape == (B, T, TRG_VOCAB)
    assert attn.shape == (B, T, S)
    assert bool(jnp.all(jnp.isfinite(output))) and bool(jnp.all(jnp.isfinite(attn)))
    print("KERNEL_OK")
</pallas_src>

<mosaic_0001>
module attributes {stable_mosaic.version = 11 : i64} {
  func.func @_out_proj_kernel(%arg0: i32, %arg1: memref<16x128xf32, #tpu.memory_space<vmem>>, %arg2: memref<128x128xbf16, #tpu.memory_space<vmem>>, %arg3: memref<1x128xf32, #tpu.memory_space<vmem>>, %arg4: memref<16x128xf32, #tpu.memory_space<vmem>>) attributes {dimension_semantics = [#tpu.dimension_semantics<parallel>], iteration_bounds = array<i64: 1>, scalar_prefetch = 0 : i64, scratch_operands = 0 : i64, tpu.core_type = #tpu.core_type<tc>, window_params = [{pipeline_mode = #tpu.pipeline_mode<synchronous>, transform_indices = @transform_0, window_bounds = array<i64: 16, 128>}, {transform_indices = @transform_1, window_bounds = array<i64: 128, 128>}, {transform_indices = @transform_2, window_bounds = array<i64: 1, 128>}, {transform_indices = @transform_3, window_bounds = array<i64: 16, 128>}]} {
    %c0 = arith.constant 0 : index
    %c0_0 = arith.constant 0 : index
    %0 = vector.load %arg1[%c0, %c0_0] : memref<16x128xf32, #tpu.memory_space<vmem>>, vector<16x128xf32>
    %1 = arith.truncf %0 : vector<16x128xf32> to vector<16x128xbf16>
    %c0_1 = arith.constant 0 : index
    %c0_2 = arith.constant 0 : index
    %2 = vector.load %arg2[%c0_1, %c0_2] : memref<128x128xbf16, #tpu.memory_space<vmem>>, vector<128x128xbf16>
    %cst = arith.constant dense<0.000000e+00> : vector<16x128xf32>
    %3 = tpu.matmul %1, %2, %cst {dimension_numbers = #tpu.dot_dimension_numbers<[1], [0], [0], [1], [0, 0, 1, 1], [], []>} : vector<16x128xbf16>, vector<128x128xbf16>, vector<16x128xf32> -> vector<16x128xf32>
    %c0_3 = arith.constant 0 : index
    %c0_4 = arith.constant 0 : index
    %4 = vector.load %arg3[%c0_3, %c0_4] : memref<1x128xf32, #tpu.memory_space<vmem>>, vector<1x128xf32>
    %5 = vector.broadcast %4 : vector<1x128xf32> to vector<16x128xf32>
    %6 = arith.addf %3, %5 : vector<16x128xf32>
    %c0_5 = arith.constant 0 : index
    %c0_6 = arith.constant 0 : index
    %7 = vector.load %arg4[%c0_5, %c0_6] : memref<16x128xf32, #tpu.memory_space<vmem>>, vector<16x128xf32>
    tpu.vector_store %arg4[%c0_5, %c0_6], %6 {strides = array<i32>} : memref<16x128xf32, #tpu.memory_space<vmem>>, vector<16x128xf32>,
    return
  }
  func.func @transform_0(%arg0: i32) -> (i32, i32) {
    %c0_i32 = arith.constant 0 : i32
    %c0_i32_0 = arith.constant 0 : i32
    %c0_i32_1 = arith.constant 0 : i32
    return %c0_i32, %c0_i32_0 : i32, i32
  }
  func.func @transform_1(%arg0: i32) -> (i32, i32) {
    %c0_i32 = arith.constant 0 : i32
    %c0_i32_0 = arith.constant 0 : i32
    return %c0_i32, %arg0 : i32, i32
  }
  func.func @transform_2(%arg0: i32) -> (i32, i32) {
    %c0_i32 = arith.constant 0 : i32
    %c0_i32_0 = arith.constant 0 : i32
    return %c0_i32, %arg0 : i32, i32
  }
  func.func @transform_3(%arg0: i32) -> (i32, i32) {
    %c0_i32 = arith.constant 0 : i32
    %c0_i32_0 = arith.constant 0 : i32
    return %c0_i32, %arg0 : i32, i32
  }
}

module attributes {stable_mosaic.version = 11 : i64} {
  func.func @_encoder_stack_kernel(%arg0: i32, %arg1: memref<2x8x128xf32, #tpu.memory_space<vmem>>, %arg2: memref<128x128xbf16, #tpu.memory_space<vmem>>, %arg3: memref<1x128xf32, #tpu.memory_space<vmem>>, %arg4: memref<128x128xbf16, #tpu.memory_space<vmem>>, %arg5: memref<1x128xf32, #tpu.memory_space<vmem>>, %arg6: memref<1x3x128x256xbf16, #tpu.memory_space<vmem>>, %arg7: memref<1x1x256xf32, #tpu.memory_space<vmem>>, %arg8: memref<2x8x128xf32, #tpu.memory_space<vmem>>, %arg9: memref<2x8x128xf32, #tpu.memory_space<vmem>>, %arg10: memref<2x8x128xf32, #tpu.memory_space<vmem>>, %arg11: memref<2x10x128xf32, #tpu.memory_space<vmem>>) attributes {dimension_semantics = [#tpu.dimension_semantics<arbitrary>], iteration_bounds = array<i64: 2>, scalar_prefetch = 0 : i64, scratch_operands = 2 : i64, tpu.core_type = #tpu.core_type<tc>, window_params = [{pipeline_mode = #tpu.pipeline_mode<synchronous>, transform_indices = @transform_0, window_bounds = array<i64: 2, 8, 128>}, {pipeline_mode = #tpu.pipeline_mode<synchronous>, transform_indices = @transform_1, window_bounds = array<i64: 128, 128>}, {pipeline_mode = #tpu.pipeline_mode<synchronous>, transform_indices = @transform_2, window_bounds = array<i64: 1, 128>}, {pipeline_mode = #tpu.pipeline_mode<synchronous>, transform_indices = @transform_3, window_bounds = array<i64: 128, 128>}, {pipeline_mode = #tpu.pipeline_mode<synchronous>, transform_indices = @transform_4, window_bounds = array<i64: 1, 128>}, {transform_indices = @transform_5, window_bounds = array<i64: 1, 3, 128, 256>}, {transform_indices = @transform_6, window_bounds = array<i64: 1, 1, 256>}, {pipeline_mode = #tpu.pipeline_mode<synchronous>, transform_indices = @transform_7, window_bounds = array<i64: 2, 8, 128>}, {pipeline_mode = #tpu.pipeline_mode<synchronous>, transform_indices = @transform_8, window_bounds = array<i64: 2, 8, 128>}]} {
    %c0_i32 = arith.constant 0 : i32
    %0 = arith.cmpi eq, %arg0, %c0_i32 : i32
    %1 = arith.extui %0 : i1 to i32
    %c0_i32_0 = arith.constant 0 : i32
    %2 = arith.cmpi ne, %1, %c0_i32_0 : i32
    scf.if %2 {
      %c0_37 = arith.constant 0 : index
      %c0_38 = arith.constant 0 : index
      %c0_39 = arith.constant 0 : index
      %44 = vector.load %arg1[%c0_37, %c0_38, %c0_39] : memref<2x8x128xf32, #tpu.memory_space<vmem>>, vector<2x8x128xf32>
      %45 = arith.truncf %44 : vector<2x8x128xf32> to vector<2x8x128xbf16>
      %c0_40 = arith.constant 0 : index
      %c0_41 = arith.constant 0 : index
      %46 = vector.load %arg2[%c0_40, %c0_41] : memref<128x128xbf16, #tpu.memory_space<vmem>>, vector<128x128xbf16>
      %cst_42 = arith.constant dense<0.000000e+00> : vector<2x8x128xf32>
      %47 = tpu.matmul %45, %46, %cst_42 {dimension_numbers = #tpu.dot_dimension_numbers<[2], [0], [0, 1], [1], [0, 0, 0, 1, 1, 1], [], []>} : vector<2x8x128xbf16>, vector<128x128xbf16>, vector<2x8x128xf32> -> vector<2x8x128xf32>
      %c0_43 = arith.constant 0 : index
      %c0_44 = arith.constant 0 : index
      %48 = vector.load %arg3[%c0_43, %c0_44] : memref<1x128xf32, #tpu.memory_space<vmem>>, vector<1x128xf32>
      %49 = vector.shape_cast %48 : vector<1x128xf32> to vector<1x1x128xf32>
      %50 = vector.broadcast %49 : vector<1x1x128xf32> to vector<2x8x128xf32>
      %51 = arith.addf %47, %50 : vector<2x8x128xf32>
      %c0_45 = arith.constant 0 : index
      %c0_46 = arith.constant 0 : index
      %c0_47 = arith.constant 0 : index
      %52 = vector.load %arg10[%c0_45, %c0_46, %c0_47] : memref<2x8x128xf32, #tpu.memory_space<vmem>>, vector<2x8x128xf32>
      tpu.vector_store %arg10[%c0_45, %c0_46, %c0_47], %51 {strides = array<i32>} : memref<2x8x128xf32, #tpu.memory_space<vmem>>, vector<2x8x128xf32>,
      %cst_48 = arith.constant 0.000000e+00 : f32
      %53 = vector.broadcast %cst_48 : f32 to vector<2x10x128xf32>
      %c0_49 = arith.constant 0 : index
      %c0_50 = arith.constant 0 : index
      %c0_51 = arith.constant 0 : index
      %54 = vector.load %arg11[%c0_49, %c0_50, %c0_51] : memref<2x10x128xf32, #tpu.memory_space<vmem>>, vector<2x10x128xf32>
      tpu.vector_store %arg11[%c0_49, %c0_50, %c0_51], %53 {strides = array<i32>} : memref<2x10x128xf32, #tpu.memory_space<vmem>>, vector<2x10x128xf32>,
    } else {
    }
    %c0 = arith.constant 0 : index
    %c0_1 = arith.constant 0 : index
    %c0_2 = arith.constant 0 : index
    %3 = vector.load %arg10[%c0, %c0_1, %c0_2] : memref<2x8x128xf32, #tpu.memory_space<vmem>>, vector<2x8x128xf32>
    %c0_3 = arith.constant 0 : index
    %c1 = arith.constant 1 : index
    %c0_4 = arith.constant 0 : index
    %4 = vector.load %arg11[%c0_3, %c1, %c0_4] : memref<2x10x128xf32, #tpu.memory_space<vmem>>, vector<2x8x128xf32>
    tpu.vector_store %arg11[%c0_3, %c1, %c0_4], %3 {strides = array<i32>} : memref<2x10x128xf32, #tpu.memory_space<vmem>>, vector<2x8x128xf32>,
    %cst = arith.constant 0.000000e+00 : f32
    %5 = vector.broadcast %cst : f32 to vector<2x8x256xf32>
    %c0_5 = arith.constant 0 : index
    %c0_6 = arith.constant 0 : index
    %c0_7 = arith.constant 0 : index
    %6 = vector.load %arg11[%c0_5, %c0_6, %c0_7] : memref<2x10x128xf32, #tpu.memory_space<vmem>>, vector<2x8x128xf32>
    %7 = arith.truncf %6 : vector<2x8x128xf32> to vector<2x8x128xbf16>
    %c0_8 = arith.constant 0 : index
    %c0_9 = arith.constant 0 : index
    %c0_10 = arith.constant 0 : index
    %c0_11 = arith.constant 0 : index
    %8 = vector.load %arg6[%c0_8, %c0_9, %c0_10, %c0_11] : memref<1x3x128x256xbf16, #tpu.memory_space<vmem>>, vector<1x1x128x256xbf16>
    %9 = vector.shape_cast %8 : vector<1x1x128x256xbf16> to vector<128x256xbf16>
    %cst_12 = arith.constant dense<0.000000e+00> : vector<2x8x256xf32>
    %10 = tpu.matmul %7, %9, %cst_12 {dimension_numbers = #tpu.dot_dimension_numbers<[2], [0], [0, 1], [1], [0, 0, 0, 1, 1, 1], [], []>} : vector<2x8x128xbf16>, vector<128x256xbf16>, vector<2x8x256xf32> -> vector<2x8x256xf32>
    %11 = arith.addf %5, %10 : vector<2x8x256xf32>
    %c0_13 = arith.constant 0 : index
    %c1_14 = arith.constant 1 : index
    %c0_15 = arith.constant 0 : index
    %12 = vector.load %arg11[%c0_13, %c1_14, %c0_15] : memref<2x10x128xf32, #tpu.memory_space<vmem>>, vector<2x8x128xf32>
    %13 = arith.truncf %12 : vector<2x8x128xf32> to vector<2x8x128xbf16>
    %c0_16 = arith.constant 0 : index
    %c1_17 = arith.constant 1 : index
    %c0_18 = arith.constant 0 : index
    %c0_19 = arith.constant 0 : index
    %14 = vector.load %arg6[%c0_16, %c1_17, %c0_18, %c0_19] : memref<1x3x128x256xbf16, #tpu.memory_space<vmem>>, vector<1x1x128x256xbf16>
    %15 = vector.shape_cast %14 : vector<1x1x128x256xbf16> to vector<128x256xbf16>
    %cst_20 = arith.constant dense<0.000000e+00> : vector<2x8x256xf32>
    %16 = tpu.matmul %13, %15, %cst_20 {dimension_numbers = #tpu.dot_dimension_numbers<[2], [0], [0, 1], [1], [0, 0, 0, 1, 1, 1], [], []>} : vector<2x8x128xbf16>, vector<128x256xbf16>, vector<2x8x256xf32> -> vector<2x8x256xf32>
    %17 = arith.addf %11, %16 : vector<2x8x256xf32>
    %c0_21 = arith.constant 0 : index
    %c2 = arith.constant 2 : index
    %c0_22 = arith.constant 0 : index
    %18 = vector.load %arg11[%c0_21, %c2, %c0_22] : memref<2x10x128xf32, #tpu.memory_space<vmem>>, vector<2x8x128xf32>
    %19 = arith.truncf %18 : vector<2x8x128xf32> to vector<2x8x128xbf16>
    %c0_23 = arith.constant 0 : index
    %c2_24 = arith.constant 2 : index
    %c0_25 = arith.constant 0 : index
    %c0_26 = arith.constant 0 : index
    %20 = vector.load %arg6[%c0_23, %c2_24, %c0_25, %c0_26] : memref<1x3x128x256xbf16, #tpu.memory_space<vmem>>, vector<1x1x128x256xbf16>
    %21 = vector.shape_cast %20 : vector<1x1x128x256xbf16> to vector<128x256xbf16>
    %cst_27 = arith.constant dense<0.000000e+00> : vector<2x8x256xf32>
    %22 = tpu.matmul %19, %21, %cst_27 {dimension_numbers = #tpu.dot_dimension_numbers<[2], [0], [0, 1], [1], [0, 0, 0, 1, 1, 1], [], []>} : vector<2x8x128xbf16>, vector<128x256xbf16>, vector<2x8x256xf32> -> vector<2x8x256xf32>
    %23 = arith.addf %17, %22 : vector<2x8x256xf32>
    %c0_28 = arith.constant 0 : index
    %c0_29 = arith.constant 0 : index
    %c0_30 = arith.constant 0 : index
    %24 = vector.load %arg7[%c0_28, %c0_29, %c0_30] : memref<1x1x256xf32, #tpu.memory_space<vmem>>, vector<1x1x256xf32>
    %25 = vector.shape_cast %24 : vector<1x1x256xf32> to vector<1x256xf32>
    %26 = vector.shape_cast %25 : vector<1x256xf32> to vector<1x1x256xf32>
    %27 = vector.broadcast %26 : vector<1x1x256xf32> to vector<2x8x256xf32>
    %28 = arith.addf %23, %27 : vector<2x8x256xf32>
    %29 = vector.extract_strided_slice %28 {offsets = [0, 0, 0], sizes = [2, 8, 128], strides = [1, 1, 1]} : vector<2x8x256xf32> to vector<2x8x128xf32>
    %30 = vector.extract_strided_slice %28 {offsets = [0, 0, 128], sizes = [2, 8, 128], strides = [1, 1, 1]} : vector<2x8x256xf32> to vector<2x8x128xf32>
    %31 = arith.negf %30 : vector<2x8x128xf32>
    %32 = math.exp %31 : vector<2x8x128xf32>
    %cst_31 = arith.constant 1.000000e+00 : f32
    %33 = vector.broadcast %cst_31 : f32 to vector<2x8x128xf32>
    %34 = arith.addf %33, %32 : vector<2x8x128xf32>
    %35 = arith.divf %33, %34 : vector<2x8x128xf32>
    %36 = arith.mulf %29, %35 : vector<2x8x128xf32>
    %37 = arith.addf %36, %3 : vector<2x8x128xf32>
    %cst_32 = arith.constant 0.707106769 : f32
    %38 = vector.broadcast %cst_32 : f32 to vector<2x8x128xf32>
    %39 = arith.mulf %37, %38 : vector<2x8x128xf32>
    %c0_33 = arith.constant 0 : index
    %c0_34 = arith.constant 0 : index
    %c0_35 = arith.constant 0 : index
    %40 = vector.load %arg10[%c0_33, %c0_34, %c0_35] : memref<2x8x128xf32, #tpu.memory_space<vmem>>, vector<2x8x128xf32>
    tpu.vector_store %arg10[%c0_33, %c0_34, %c0_35], %39 {strides = array<i32>} : memref<2x8x128xf32, #tpu.memory_space<vmem>>, vector<2x8x128xf32>,
    %c1_i32 = arith.constant 1 : i32
    %41 = arith.cmpi eq, %arg0, %c1_i32 : i32
    %42 = arith.extui %41 : i1 to i32
    %c0_i32_36 = arith.constant 0 : i32
    %43 = arith.cmpi ne, %42, %c0_i32_36 : i32
    scf.if %43 {
      %44 = arith.truncf %39 : vector<2x8x128xf32> to vector<2x8x128xbf16>
      %c0_37 = arith.constant 0 : index
      %c0_38 = arith.constant 0 : index
      %45 = vector.load %arg4[%c0_37, %c0_38] : memref<128x128xbf16, #tpu.memory_space<vmem>>, vector<128x128xbf16>
      %cst_39 = arith.constant dense<0.000000e+00> : vector<2x8x128xf32>
      %46 = tpu.matmul %44, %45, %cst_39 {dimension_numbers = #tpu.dot_dimension_numbers<[2], [0], [0, 1], [1], [0, 0, 0, 1, 1, 1], [], []>} : vector<2x8x128xbf16>, vector<128x128xbf16>, vector<2x8x128xf32> -> vector<2x8x128xf32>
      %c0_40 = arith.constant 0 : index
      %c0_41 = arith.constant 0 : index
      %47 = vector.load %arg5[%c0_40, %c0_41] : memref<1x128xf32, #tpu.memory_space<vmem>>, vector<1x128xf32>
      %48 = vector.shape_cast %47 : vector<1x128xf32> to vector<1x1x128xf32>
      %49 = vector.broadcast %48 : vector<1x1x128xf32> to vector<2x8x128xf32>
      %50 = arith.addf %46, %49 : vector<2x8x128xf32>
      %c0_42 = arith.constant 0 : index
      %c0_43 = arith.constant 0 : index
      %c0_44 = arith.constant 0 : index
      %51 = vector.load %arg8[%c0_42, %c0_43, %c0_44] : memref<2x8x128xf32, #tpu.memory_space<vmem>>, vector<2x8x128xf32>
      tpu.vector_store %arg8[%c0_42, %c0_43, %c0_44], %50 {strides = array<i32>} : memref<2x8x128xf32, #tpu.memory_space<vmem>>, vector<2x8x128xf32>,
      %c0_45 = arith.constant 0 : index
      %c0_46 = arith.constant 0 : index
      %c0_47 = arith.constant 0 : index
      %52 = vector.load %arg1[%c0_45, %c0_46, %c0_47] : memref<2x8x128xf32, #tpu.memory_space<vmem>>, vector<2x8x128xf32>
      %53 = arith.addf %50, %52 : vector<2x8x128xf32>
      %cst_48 = arith.constant 0.707106769 : f32
      %54 = vector.broadcast %cst_48 : f32 to vector<2x8x128xf32>
      %55 = arith.mulf %53, %54 : vector<2x8x128xf32>
      %c0_49 = arith.constant 0 : index
      %c0_50 = arith.constant 0 : index
      %c0_51 = arith.constant 0 : index
      %56 = vector.load %arg9[%c0_49, %c0_50, %c0_51] : memref<2x8x128xf32, #tpu.memory_space<vmem>>, vector<2x8x128xf32>
      tpu.vector_store %arg9[%c0_49, %c0_50, %c0_51], %55 {strides = array<i32>} : memref<2x8x128xf32, #tpu.memory_space<vmem>>, vector<2x8x128xf32>,
    } else {
    }
    return
  }
  func.func @transform_0(%arg0: i32) -> (i32, i32, i32) {
    %c0_i32 = arith.constant 0 : i32
    %c0_i32_0 = arith.constant 0 : i32
    %c0_i32_1 = arith.constant 0 : i32
    %c0_i32_2 = arith.constant 0 : i32
    return %c0_i32, %c0_i32_0, %c0_i32_1 : i32, i32, i32
  }
  func.func @transform_1(%arg0: i32) -> (i32, i32) {
    %c0_i32 = arith.constant 0 : i32
    %c0_i32_0 = arith.constant 0 : i32
    %c0_i32_1 = arith.constant 0 : i32
    return %c0_i32, %c0_i32_0 : i32, i32
  }
  func.func @transform_2(%arg0: i32) -> (i32, i32) {
    %c0_i32 = arith.constant 0 : i32
    %c0_i32_0 = arith.constant 0 : i32
    %c0_i32_1 = arith.constant 0 : i32
    return %c0_i32, %c0_i32_0 : i32, i32
  }
  func.func @transform_3(%arg0: i32) -> (i32, i32) {
    %c0_i32 = arith.constant 0 : i32
    %c0_i32_0 = arith.constant 0 : i32
    %c0_i32_1 = arith.constant 0 : i32
    return %c0_i32, %c0_i32_0 : i32, i32
  }
  func.func @transform_4(%arg0: i32) -> (i32, i32) {
    %c0_i32 = arith.constant 0 : i32
    %c0_i32_0 = arith.constant 0 : i32
    %c0_i32_1 = arith.constant 0 : i32
    return %c0_i32, %c0_i32_0 : i32, i32
  }
  func.func @transform_5(%arg0: i32) -> (i32, i32, i32, i32) {
    %c0_i32 = arith.constant 0 : i32
    %c0_i32_0 = arith.constant 0 : i32
    %c0_i32_1 = arith.constant 0 : i32
    %c0_i32_2 = arith.constant 0 : i32
    return %arg0, %c0_i32, %c0_i32_0, %c0_i32_1 : i32, i32, i32, i32
  }
  func.func @transform_6(%arg0: i32) -> (i32, i32, i32) {
    %c0_i32 = arith.constant 0 : i32
    %c0_i32_0 = arith.constant 0 : i32
    %c0_i32_1 = arith.constant 0 : i32
    return %arg0, %c0_i32, %c0_i32_0 : i32, i32, i32
  }
  func.func @transform_7(%arg0: i32) -> (i32, i32, i32) {
    %c0_i32 = arith.constant 0 : i32
    %c0_i32_0 = arith.constant 0 : i32
    %c0_i32_1 = arith.constant 0 : i32
    %c0_i32_2 = arith.constant 0 : i32
    return %c0_i32, %c0_i32_0, %c0_i32_1 : i32, i32, i32
  }
  func.func @transform_8(%arg0: i32) -> (i32, i32, i32) {
    %c0_i32 = arith.constant 0 : i32
    %c0_i32_0 = arith.constant 0 : i32
    %c0_i32_1 = arith.constant 0 : i32
    %c0_i32_2 = arith.constant 0 : i32
    return %c0_i32, %c0_i32_0, %c0_i32_1 : i32, i32, i32
  }
}

module attributes {stable_mosaic.version = 11 : i64} {
  func.func @_decoder_stack_kernel(%arg0: i32, %arg1: memref<2x8x128xf32, #tpu.memory_space<vmem>>, %arg2: memref<2x8x128xf32, #tpu.memory_space<vmem>>, %arg3: memref<2x8x128xf32, #tpu.memory_space<vmem>>, %arg4: memref<128x128xbf16, #tpu.memory_space<vmem>>, %arg5: memref<1x128xf32, #tpu.memory_space<vmem>>, %arg6: memref<1x3x128x256xbf16, #tpu.memory_space<vmem>>, %arg7: memref<1x1x256xf32, #tpu.memory_space<vmem>>, %arg8: memref<128x128xbf16, #tpu.memory_space<vmem>>, %arg9: memref<1x128xf32, #tpu.memory_space<vmem>>, %arg10: memref<128x128xbf16, #tpu.memory_space<vmem>>, %arg11: memref<1x128xf32, #tpu.memory_space<vmem>>, %arg12: memref<128x128xbf16, #tpu.memory_space<vmem>>, %arg13: memref<1x128xf32, #tpu.memory_space<vmem>>, %arg14: memref<2x8x128xf32, #tpu.memory_space<vmem>>, %arg15: memref<2x8x8xf32, #tpu.memory_space<vmem>>, %arg16: memref<2x8x128xf32, #tpu.memory_space<vmem>>, %arg17: memref<2x10x128xf32, #tpu.memory_space<vmem>>) attributes {dimension_semantics = [#tpu.dimension_semantics<arbitrary>], iteration_bounds = array<i64: 2>, scalar_prefetch = 0 : i64, scratch_operands = 2 : i64, tpu.core_type = #tpu.core_type<tc>, window_params = [{pipeline_mode = #tpu.pipeline_mode<synchronous>, transform_indices = @transform_0, window_bounds = array<i64: 2, 8, 128>}, {pipeline_mode = #tpu.pipeline_mode<synchronous>, transform_indices = @transform_1, window_bounds = array<i64: 2, 8, 128>}, {pipeline_mode = #tpu.pipeline_mode<synchronous>, transform_indices = @transform_2, window_bounds = array<i64: 2, 8, 128>}, {pipeline_mode = #tpu.pipeline_mode<synchronous>, transform_indices = @transform_3, window_bounds = array<i64: 128, 128>}, {pipeline_mode = #tpu.pipeline_mode<synchronous>, transform_indices = @transform_4, window_bounds = array<i64: 1, 128>}, {transform_indices = @transform_5, window_bounds = array<i64: 1, 3, 128, 256>}, {transform_indices = @transform_6, window_bounds = array<i64: 1, 1, 256>}, {pipeline_mode = #tpu.pipeline_mode<synchronous>, transform_indices = @transform_7, window_bounds = array<i64: 128, 128>}, {pipeline_mode = #tpu.pipeline_mode<synchronous>, transform_indices = @transform_8, window_bounds = array<i64: 1, 128>}, {pipeline_mode = #tpu.pipeline_mode<synchronous>, transform_indices = @transform_9, window_bounds = array<i64: 128, 128>}, {pipeline_mode = #tpu.pipeline_mode<synchronous>, transform_indices = @transform_10, window_bounds = array<i64: 1, 128>}, {pipeline_mode = #tpu.pipeline_mode<synchronous>, transform_indices = @transform_11, window_bounds = array<i64: 128, 128>}, {pipeline_mode = #tpu.pipeline_mode<synchronous>, transform_indices = @transform_12, window_bounds = array<i64: 1, 128>}, {pipeline_mode = #tpu.pipeline_mode<synchronous>, transform_indices = @transform_13, window_bounds = array<i64: 2, 8, 128>}, {pipeline_mode = #tpu.pipeline_mode<synchronous>, transform_indices = @transform_14, window_bounds = array<i64: 2, 8, 8>}]} {
    %c0_i32 = arith.constant 0 : i32
    %0 = arith.cmpi eq, %arg0, %c0_i32 : i32
    %1 = arith.extui %0 : i1 to i32
    %c0_i32_0 = arith.constant 0 : i32
    %2 = arith.cmpi ne, %1, %c0_i32_0 : i32
    scf.if %2 {
      %c0_65 = arith.constant 0 : index
      %c0_66 = arith.constant 0 : index
      %c0_67 = arith.constant 0 : index
      %84 = vector.load %arg1[%c0_65, %c0_66, %c0_67] : memref<2x8x128xf32, #tpu.memory_space<vmem>>, vector<2x8x128xf32>
      %85 = arith.truncf %84 : vector<2x8x128xf32> to vector<2x8x128xbf16>
      %c0_68 = arith.constant 0 : index
      %c0_69 = arith.constant 0 : index
      %86 = vector.load %arg4[%c0_68, %c0_69] : memref<128x128xbf16, #tpu.memory_space<vmem>>, vector<128x128xbf16>
      %cst_70 = arith.constant dense<0.000000e+00> : vector<2x8x128xf32>
      %87 = tpu.matmul %85, %86, %cst_70 {dimension_numbers = #tpu.dot_dimension_numbers<[2], [0], [0, 1], [1], [0, 0, 0, 1, 1, 1], [], []>} : vector<2x8x128xbf16>, vector<128x128xbf16>, vector<2x8x128xf32> -> vector<2x8x128xf32>
      %c0_71 = arith.constant 0 : index
      %c0_72 = arith.constant 0 : index
      %88 = vector.load %arg5[%c0_71, %c0_72] : memref<1x128xf32, #tpu.memory_space<vmem>>, vector<1x128xf32>
      %89 = vector.shape_cast %88 : vector<1x128xf32> to vector<1x1x128xf32>
      %90 = vector.broadcast %89 : vector<1x1x128xf32> to vector<2x8x128xf32>
      %91 = arith.addf %87, %90 : vector<2x8x128xf32>
      %c0_73 = arith.constant 0 : index
      %c0_74 = arith.constant 0 : index
      %c0_75 = arith.constant 0 : index
      %92 = vector.load %arg16[%c0_73, %c0_74, %c0_75] : memref<2x8x128xf32, #tpu.memory_space<vmem>>, vector<2x8x128xf32>
      tpu.vector_store %arg16[%c0_73, %c0_74, %c0_75], %91 {strides = array<i32>} : memref<2x8x128xf32, #tpu.memory_space<vmem>>, vector<2x8x128xf32>,
      %cst_76 = arith.constant 0.000000e+00 : f32
      %93 = vector.broadcast %cst_76 : f32 to vector<2x10x128xf32>
      %c0_77 = arith.constant 0 : index
      %c0_78 = arith.constant 0 : index
      %c0_79 = arith.constant 0 : index
      %94 = vector.load %arg17[%c0_77, %c0_78, %c0_79] : memref<2x10x128xf32, #tpu.memory_space<vmem>>, vector<2x10x128xf32>
      tpu.vector_store %arg17[%c0_77, %c0_78, %c0_79], %93 {strides = array<i32>} : memref<2x10x128xf32, #tpu.memory_space<vmem>>, vector<2x10x128xf32>,
    } else {
    }
    %c0 = arith.constant 0 : index
    %c0_1 = arith.constant 0 : index
    %c0_2 = arith.constant 0 : index
    %3 = vector.load %arg16[%c0, %c0_1, %c0_2] : memref<2x8x128xf32, #tpu.memory_space<vmem>>, vector<2x8x128xf32>
    %c0_3 = arith.constant 0 : index
    %c2 = arith.constant 2 : index
    %c0_4 = arith.constant 0 : index
    %4 = vector.load %arg17[%c0_3, %c2, %c0_4] : memref<2x10x128xf32, #tpu.memory_space<vmem>>, vector<2x8x128xf32>
    tpu.vector_store %arg17[%c0_3, %c2, %c0_4], %3 {strides = array<i32>} : memref<2x10x128xf32, #tpu.memory_space<vmem>>, vector<2x8x128xf32>,
    %cst = arith.constant 0.000000e+00 : f32
    %5 = vector.broadcast %cst : f32 to vector<2x8x256xf32>
    %c0_5 = arith.constant 0 : index
    %c0_6 = arith.constant 0 : index
    %c0_7 = arith.constant 0 : index
    %6 = vector.load %arg17[%c0_5, %c0_6, %c0_7] : memref<2x10x128xf32, #tpu.memory_space<vmem>>, vector<2x8x128xf32>
    %7 = arith.truncf %6 : vector<2x8x128xf32> to vector<2x8x128xbf16>
    %c0_8 = arith.constant 0 : index
    %c0_9 = arith.constant 0 : index
    %c0_10 = arith.constant 0 : index
    %c0_11 = arith.constant 0 : index
    %8 = vector.load %arg6[%c0_8, %c0_9, %c0_10, %c0_11] : memref<1x3x128x256xbf16, #tpu.memory_space<vmem>>, vector<1x1x128x256xbf16>
    %9 = vector.shape_cast %8 : vector<1x1x128x256xbf16> to vector<128x256xbf16>
    %cst_12 = arith.constant dense<0.000000e+00> : vector<2x8x256xf32>
    %10 = tpu.matmul %7, %9, %cst_12 {dimension_numbers = #tpu.dot_dimension_numbers<[2], [0], [0, 1], [1], [0, 0, 0, 1, 1, 1], [], []>} : vector<2x8x128xbf16>, vector<128x256xbf16>, vector<2x8x256xf32> -> vector<2x8x256xf32>
    %11 = arith.addf %5, %10 : vector<2x8x256xf32>
    %c0_13 = arith.constant 0 : index
    %c1 = arith.constant 1 : index
    %c0_14 = arith.constant 0 : index
    %12 = vector.load %arg17[%c0_13, %c1, %c0_14] : memref<2x10x128xf32, #tpu.memory_space<vmem>>, vector<2x8x128xf32>
    %13 = arith.truncf %12 : vector<2x8x128xf32> to vector<2x8x128xbf16>
    %c0_15 = arith.constant 0 : index
    %c1_16 = arith.constant 1 : index
    %c0_17 = arith.constant 0 : index
    %c0_18 = arith.constant 0 : index
    %14 = vector.load %arg6[%c0_15, %c1_16, %c0_17, %c0_18] : memref<1x3x128x256xbf16, #tpu.memory_space<vmem>>, vector<1x1x128x256xbf16>
    %15 = vector.shape_cast %14 : vector<1x1x128x256xbf16> to vector<128x256xbf16>
    %cst_19 = arith.constant dense<0.000000e+00> : vector<2x8x256xf32>
    %16 = tpu.matmul %13, %15, %cst_19 {dimension_numbers = #tpu.dot_dimension_numbers<[2], [0], [0, 1], [1], [0, 0, 0, 1, 1, 1], [], []>} : vector<2x8x128xbf16>, vector<128x256xbf16>, vector<2x8x256xf32> -> vector<2x8x256xf32>
    %17 = arith.addf %11, %16 : vector<2x8x256xf32>
    %c0_20 = arith.constant 0 : index
    %c2_21 = arith.constant 2 : index
    %c0_22 = arith.constant 0 : index
    %18 = vector.load %arg17[%c0_20, %c2_21, %c0_22] : memref<2x10x128xf32, #tpu.memory_space<vmem>>, vector<2x8x128xf32>
    %19 = arith.truncf %18 : vector<2x8x128xf32> to vector<2x8x128xbf16>
    %c0_23 = arith.constant 0 : index
    %c2_24 = arith.constant 2 : index
    %c0_25 = arith.constant 0 : index
    %c0_26 = arith.constant 0 : index
    %20 = vector.load %arg6[%c0_23, %c2_24, %c0_25, %c0_26] : memref<1x3x128x256xbf16, #tpu.memory_space<vmem>>, vector<1x1x128x256xbf16>
    %21 = vector.shape_cast %20 : vector<1x1x128x256xbf16> to vector<128x256xbf16>
    %cst_27 = arith.constant dense<0.000000e+00> : vector<2x8x256xf32>
    %22 = tpu.matmul %19, %21, %cst_27 {dimension_numbers = #tpu.dot_dimension_numbers<[2], [0], [0, 1], [1], [0, 0, 0, 1, 1, 1], [], []>} : vector<2x8x128xbf16>, vector<128x256xbf16>, vector<2x8x256xf32> -> vector<2x8x256xf32>
    %23 = arith.addf %17, %22 : vector<2x8x256xf32>
    %c0_28 = arith.constant 0 : index
    %c0_29 = arith.constant 0 : index
    %c0_30 = arith.constant 0 : index
    %24 = vector.load %arg7[%c0_28, %c0_29, %c0_30] : memref<1x1x256xf32, #tpu.memory_space<vmem>>, vector<1x1x256xf32>
    %25 = vector.shape_cast %24 : vector<1x1x256xf32> to vector<1x256xf32>
    %26 = vector.shape_cast %25 : vector<1x256xf32> to vector<1x1x256xf32>
    %27 = vector.broadcast %26 : vector<1x1x256xf32> to vector<2x8x256xf32>
    %28 = arith.addf %23, %27 : vector<2x8x256xf32>
    %29 = vector.extract_strided_slice %28 {offsets = [0, 0, 0], sizes = [2, 8, 128], strides = [1, 1, 1]} : vector<2x8x256xf32> to vector<2x8x128xf32>
    %30 = vector.extract_strided_slice %28 {offsets = [0, 0, 128], sizes = [2, 8, 128], strides = [1, 1, 1]} : vector<2x8x256xf32> to vector<2x8x128xf32>
    %31 = arith.negf %30 : vector<2x8x128xf32>
    %32 = math.exp %31 : vector<2x8x128xf32>
    %cst_31 = arith.constant 1.000000e+00 : f32
    %33 = vector.broadcast %cst_31 : f32 to vector<2x8x128xf32>
    %34 = arith.addf %33, %32 : vector<2x8x128xf32>
    %35 = arith.divf %33, %34 : vector<2x8x128xf32>
    %36 = arith.mulf %29, %35 : vector<2x8x128xf32>
    %37 = arith.truncf %36 : vector<2x8x128xf32> to vector<2x8x128xbf16>
    %c0_32 = arith.constant 0 : index
    %c0_33 = arith.constant 0 : index
    %38 = vector.load %arg8[%c0_32, %c0_33] : memref<128x128xbf16, #tpu.memory_space<vmem>>, vector<128x128xbf16>
    %cst_34 = arith.constant dense<0.000000e+00> : vector<2x8x128xf32>
    %39 = tpu.matmul %37, %38, %cst_34 {dimension_numbers = #tpu.dot_dimension_numbers<[2], [0], [0, 1], [1], [0, 0, 0, 1, 1, 1], [], []>} : vector<2x8x128xbf16>, vector<128x128xbf16>, vector<2x8x128xf32> -> vector<2x8x128xf32>
    %c0_35 = arith.constant 0 : index
    %c0_36 = arith.constant 0 : index
    %40 = vector.load %arg9[%c0_35, %c0_36] : memref<1x128xf32, #tpu.memory_space<vmem>>, vector<1x128xf32>
    %41 = vector.shape_cast %40 : vector<1x128xf32> to vector<1x1x128xf32>
    %42 = vector.broadcast %41 : vector<1x1x128xf32> to vector<2x8x128xf32>
    %43 = arith.addf %39, %42 : vector<2x8x128xf32>
    %c0_37 = arith.constant 0 : index
    %c0_38 = arith.constant 0 : index
    %c0_39 = arith.constant 0 : index
    %44 = vector.load %arg1[%c0_37, %c0_38, %c0_39] : memref<2x8x128xf32, #tpu.memory_space<vmem>>, vector<2x8x128xf32>
    %45 = arith.addf %43, %44 : vector<2x8x128xf32>
    %cst_40 = arith.constant 0.707106769 : f32
    %46 = vector.broadcast %cst_40 : f32 to vector<2x8x128xf32>
    %47 = arith.mulf %45, %46 : vector<2x8x128xf32>
    %48 = arith.truncf %47 : vector<2x8x128xf32> to vector<2x8x128xbf16>
    %c0_41 = arith.constant 0 : index
    %c0_42 = arith.constant 0 : index
    %c0_43 = arith.constant 0 : index
    %49 = vector.load %arg2[%c0_41, %c0_42, %c0_43] : memref<2x8x128xf32, #tpu.memory_space<vmem>>, vector<2x8x128xf32>
    %50 = arith.truncf %49 : vector<2x8x128xf32> to vector<2x8x128xbf16>
    "tpu.trace_start"() <{level = 10 : i32, message = "bte,bse->bts"}> : () -> ()
    %cst_44 = arith.constant dense<0.000000e+00> : vector<2x8x8xf32>
    %51 = tpu.matmul %48, %50, %cst_44 {dimension_numbers = #tpu.dot_dimension_numbers<[2], [2], [1], [1], [0, 0, 0, 1, 1, 1], [0], [0]>} : vector<2x8x128xbf16>, vector<2x8x128xbf16>, vector<2x8x8xf32> -> vector<2x8x8xf32>
    "tpu.trace_stop"() : () -> ()
    %cst_45 = arith.constant dense<0xFF800000> : vector<2x8xf32>
    %52 = vector.multi_reduction <maximumf>, %51, %cst_45 [2] : vector<2x8x8xf32> to vector<2x8xf32>
    %53 = vector.shape_cast %52 : vector<2x8xf32> to vector<2x8x1xf32>
    %54 = vector.broadcast %53 : vector<2x8x1xf32> to vector<2x8x8xf32>
    %55 = arith.subf %51, %54 : vector<2x8x8xf32>
    %56 = math.exp %55 : vector<2x8x8xf32>
    %cst_46 = arith.constant dense<0.000000e+00> : vector<2x8xf32>
    %57 = vector.multi_reduction <add>, %56, %cst_46 [2] : vector<2x8x8xf32> to vector<2x8xf32>
    %58 = vector.shape_cast %57 : vector<2x8xf32> to vector<2x8x1xf32>
    %59 = tpu.reciprocal %58 {approx = true} : vector<2x8x1xf32> -> vector<2x8x1xf32>
    %60 = vector.broadcast %59 : vector<2x8x1xf32> to vector<2x8x8xf32>
    %61 = arith.mulf %56, %60 : vector<2x8x8xf32>
    %62 = arith.truncf %61 : vector<2x8x8xf32> to vector<2x8x8xbf16>
    %c0_47 = arith.constant 0 : index
    %c0_48 = arith.constant 0 : index
    %c0_49 = arith.constant 0 : index
    %63 = vector.load %arg3[%c0_47, %c0_48, %c0_49] : memref<2x8x128xf32, #tpu.memory_space<vmem>>, vector<2x8x128xf32>
    %64 = arith.truncf %63 : vector<2x8x128xf32> to vector<2x8x128xbf16>
    "tpu.trace_start"() <{level = 10 : i32, message = "bts,bse->bte"}> : () -> ()
    %cst_50 = arith.constant dense<0.000000e+00> : vector<2x8x128xf32>
    %65 = tpu.matmul %62, %64, %cst_50 {dimension_numbers = #tpu.dot_dimension_numbers<[2], [1], [1], [2], [0, 0, 0, 1, 1, 2], [0], [0]>} : vector<2x8x8xbf16>, vector<2x8x128xbf16>, vector<2x8x128xf32> -> vector<2x8x128xf32>
    "tpu.trace_stop"() : () -> ()
    %66 = arith.truncf %65 : vector<2x8x128xf32> to vector<2x8x128xbf16>
    %c0_51 = arith.constant 0 : index
    %c0_52 = arith.constant 0 : index
    %67 = vector.load %arg10[%c0_51, %c0_52] : memref<128x128xbf16, #tpu.memory_space<vmem>>, vector<128x128xbf16>
    %cst_53 = arith.constant dense<0.000000e+00> : vector<2x8x128xf32>
    %68 = tpu.matmul %66, %67, %cst_53 {dimension_numbers = #tpu.dot_dimension_numbers<[2], [0], [0, 1], [1], [0, 0, 0, 1, 1, 1], [], []>} : vector<2x8x128xbf16>, vector<128x128xbf16>, vector<2x8x128xf32> -> vector<2x8x128xf32>
    %c0_54 = arith.constant 0 : index
    %c0_55 = arith.constant 0 : index
    %69 = vector.load %arg11[%c0_54, %c0_55] : memref<1x128xf32, #tpu.memory_space<vmem>>, vector<1x128xf32>
    %70 = vector.shape_cast %69 : vector<1x128xf32> to vector<1x1x128xf32>
    %71 = vector.broadcast %70 : vector<1x1x128xf32> to vector<2x8x128xf32>
    %72 = arith.addf %68, %71 : vector<2x8x128xf32>
    %73 = arith.addf %36, %72 : vector<2x8x128xf32>
    %cst_56 = arith.constant 0.707106769 : f32
    %74 = vector.broadcast %cst_56 : f32 to vector<2x8x128xf32>
    %75 = arith.mulf %73, %74 : vector<2x8x128xf32>
    %76 = arith.addf %75, %3 : vector<2x8x128xf32>
    %cst_57 = arith.constant 0.707106769 : f32
    %77 = vector.broadcast %cst_57 : f32 to vector<2x8x128xf32>
    %78 = arith.mulf %76, %77 : vector<2x8x128xf32>
    %c0_58 = arith.constant 0 : index
    %c0_59 = arith.constant 0 : index
    %c0_60 = arith.constant 0 : index
    %79 = vector.load %arg16[%c0_58, %c0_59, %c0_60] : memref<2x8x128xf32, #tpu.memory_space<vmem>>, vector<2x8x128xf32>
    tpu.vector_store %arg16[%c0_58, %c0_59, %c0_60], %78 {strides = array<i32>} : memref<2x8x128xf32, #tpu.memory_space<vmem>>, vector<2x8x128xf32>,
    %c0_61 = arith.constant 0 : index
    %c0_62 = arith.constant 0 : index
    %c0_63 = arith.constant 0 : index
    %80 = vector.load %arg15[%c0_61, %c0_62, %c0_63] : memref<2x8x8xf32, #tpu.memory_space<vmem>>, vector<2x8x8xf32>
    tpu.vector_store %arg15[%c0_61, %c0_62, %c0_63], %61 {strides = array<i32>} : memref<2x8x8xf32, #tpu.memory_space<vmem>>, vector<2x8x8xf32>,
    %c1_i32 = arith.constant 1 : i32
    %81 = arith.cmpi eq, %arg0, %c1_i32 : i32
    %82 = arith.extui %81 : i1 to i32
    %c0_i32_64 = arith.constant 0 : i32
    %83 = arith.cmpi ne, %82, %c0_i32_64 : i32
    scf.if %83 {
      %84 = arith.truncf %78 : vector<2x8x128xf32> to vector<2x8x128xbf16>
      %c0_65 = arith.constant 0 : index
      %c0_66 = arith.constant 0 : index
      %85 = vector.load %arg12[%c0_65, %c0_66] : memref<128x128xbf16, #tpu.memory_space<vmem>>, vector<128x128xbf16>
      %cst_67 = arith.constant dense<0.000000e+00> : vector<2x8x128xf32>
      %86 = tpu.matmul %84, %85, %cst_67 {dimension_numbers = #tpu.dot_dimension_numbers<[2], [0], [0, 1], [1], [0, 0, 0, 1, 1, 1], [], []>} : vector<2x8x128xbf16>, vector<128x128xbf16>, vector<2x8x128xf32> -> vector<2x8x128xf32>
      %c0_68 = arith.constant 0 : index
      %c0_69 = arith.constant 0 : index
      %87 = vector.load %arg13[%c0_68, %c0_69] : memref<1x128xf32, #tpu.memory_space<vmem>>, vector<1x128xf32>
      %88 = vector.shape_cast %87 : vector<1x128xf32> to vector<1x1x128xf32>
      %89 = vector.broadcast %88 : vector<1x1x128xf32> to vector<2x8x128xf32>
      %90 = arith.addf %86, %89 : vector<2x8x128xf32>
      %c0_70 = arith.constant 0 : index
      %c0_71 = arith.constant 0 : index
      %c0_72 = arith.constant 0 : index
      %91 = vector.load %arg14[%c0_70, %c0_71, %c0_72] : memref<2x8x128xf32, #tpu.memory_space<vmem>>, vector<2x8x128xf32>
      tpu.vector_store %arg14[%c0_70, %c0_71, %c0_72], %90 {strides = array<i32>} : memref<2x8x128xf32, #tpu.memory_space<vmem>>, vector<2x8x128xf32>,
    } else {
    }
    return
  }
  func.func @transform_0(%arg0: i32) -> (i32, i32, i32) {
    %c0_i32 = arith.constant 0 : i32
    %c0_i32_0 = arith.constant 0 : i32
    %c0_i32_1 = arith.constant 0 : i32
    %c0_i32_2 = arith.constant 0 : i32
    return %c0_i32, %c0_i32_0, %c0_i32_1 : i32, i32, i32
  }
  func.func @transform_1(%arg0: i32) -> (i32, i32, i32) {
    %c0_i32 = arith.constant 0 : i32
    %c0_i32_0 = arith.constant 0 : i32
    %c0_i32_1 = arith.constant 0 : i32
    %c0_i32_2 = arith.constant 0 : i32
    return %c0_i32, %c0_i32_0, %c0_i32_1 : i32, i32, i32
  }
  func.func @transform_2(%arg0: i32) -> (i32, i32, i32) {
    %c0_i32 = arith.constant 0 : i32
    %c0_i32_0 = arith.constant 0 : i32
    %c0_i32_1 = arith.constant 0 : i32
    %c0_i32_2 = arith.constant 0 : i32
    return %c0_i32, %c0_i32_0, %c0_i32_1 : i32, i32, i32
  }
  func.func @transform_3(%arg0: i32) -> (i32, i32) {
    %c0_i32 = arith.constant 0 : i32
    %c0_i32_0 = arith.constant 0 : i32
    %c0_i32_1 = arith.constant 0 : i32
    return %c0_i32, %c0_i32_0 : i32, i32
  }
  func.func @transform_4(%arg0: i32) -> (i32, i32) {
    %c0_i32 = arith.constant 0 : i32
    %c0_i32_0 = arith.constant 0 : i32
    %c0_i32_1 = arith.constant 0 : i32
    return %c0_i32, %c0_i32_0 : i32, i32
  }
  func.func @transform_5(%arg0: i32) -> (i32, i32, i32, i32) {
    %c0_i32 = arith.constant 0 : i32
    %c0_i32_0 = arith.constant 0 : i32
    %c0_i32_1 = arith.constant 0 : i32
    %c0_i32_2 = arith.constant 0 : i32
    return %arg0, %c0_i32, %c0_i32_0, %c0_i32_1 : i32, i32, i32, i32
  }
  func.func @transform_6(%arg0: i32) -> (i32, i32, i32) {
    %c0_i32 = arith.constant 0 : i32
    %c0_i32_0 = arith.constant 0 : i32
    %c0_i32_1 = arith.constant 0 : i32
    return %arg0, %c0_i32, %c0_i32_0 : i32, i32, i32
  }
  func.func @transform_7(%arg0: i32) -> (i32, i32) {
    %c0_i32 = arith.constant 0 : i32
    %c0_i32_0 = arith.constant 0 : i32
    %c0_i32_1 = arith.constant 0 : i32
    return %c0_i32, %c0_i32_0 : i32, i32
  }
  func.func @transform_8(%arg0: i32) -> (i32, i32) {
    %c0_i32 = arith.constant 0 : i32
    %c0_i32_0 = arith.constant 0 : i32
    %c0_i32_1 = arith.constant 0 : i32
    return %c0_i32, %c0_i32_0 : i32, i32
  }
  func.func @transform_9(%arg0: i32) -> (i32, i32) {
    %c0_i32 = arith.constant 0 : i32
    %c0_i32_0 = arith.constant 0 : i32
    %c0_i32_1 = arith.constant 0 : i32
    return %c0_i32, %c0_i32_0 : i32, i32
  }
  func.func @transform_10(%arg0: i32) -> (i32, i32) {
    %c0_i32 = arith.constant 0 : i32
    %c0_i32_0 = arith.constant 0 : i32
    %c0_i32_1 = arith.constant 0 : i32
    return %c0_i32, %c0_i32_0 : i32, i32
  }
  func.func @transform_11(%arg0: i32) -> (i32, i32) {
    %c0_i32 = arith.constant 0 : i32
    %c0_i32_0 = arith.constant 0 : i32
    %c0_i32_1 = arith.constant 0 : i32
    return %c0_i32, %c0_i32_0 : i32, i32
  }
  func.func @transform_12(%arg0: i32) -> (i32, i32) {
    %c0_i32 = arith.constant 0 : i32
    %c0_i32_0 = arith.constant 0 : i32
    %c0_i32_1 = arith.constant 0 : i32
    return %c0_i32, %c0_i32_0 : i32, i32
  }
  func.func @transform_13(%arg0: i32) -> (i32, i32, i32) {
    %c0_i32 = arith.constant 0 : i32
    %c0_i32_0 = arith.constant 0 : i32
    %c0_i32_1 = arith.constant 0 : i32
    %c0_i32_2 = arith.constant 0 : i32
    return %c0_i32, %c0_i32_0, %c0_i32_1 : i32, i32, i32
  }
  func.func @transform_14(%arg0: i32) -> (i32, i32, i32) {
    %c0_i32 = arith.constant 0 : i32
    %c0_i32_0 = arith.constant 0 : i32
    %c0_i32_1 = arith.constant 0 : i32
    %c0_i32_2 = arith.constant 0 : i32
    return %c0_i32, %c0_i32_0, %c0_i32_1 : i32, i32, i32
  }
}

</mosaic_0001>

<bundles_post_ra>
// kernel: seq2seq_forward.5
= control target key start
LH: loop header
LB: loop body
LE: loop exit
PB: predicated region body
PF: predicated region fallthrough
CT: control target
= control target key end

     0   :  { %8 = vsyncpa [#allocation3], 0  ;;  %s192_s15 = smov [#allocation2]   ;;  %s193_s17 = smov 64   ;;  %s233_s0 = inlined_call_operand.vmem [shape: f32[16,128], index: 0, kind: input, shape index: {}]   ;;  %s234_s1 = inlined_call_operand.hbm [shape: bf16[128,128], index: 1, kind: input, shape index: {}]   ;;  %s235_s2 = inlined_call_operand.vmem [shape: f32[1,128], index: 2, kind: input, shape index: {}]   ;;  %s236_s3 = inlined_call_operand.vmem [shape: f32[16,128], index: 3, kind: output, shape index: {}]  }
   0x1   :  { %s15_s14 = sshll.u32 %s234_s1, 4  ;;  %s17_s16 = sshll.u32 %s192_s15, 4  ;;  %s16_s14 = int_to_ptr.hbm [resolvable:$true] %s15_s14  ;;  %s18_s16 = int_to_ptr.vmem [resolvable:$true] %s17_s16 }
   0x2   :  { %s194_s18 = smov 4  }
   0x3   :  { %23 = dma.hbm_to_vmem [thread:$0]  %s16_s14, 1024, %s18_s16, [#allocation3], %s193_s17, %s193_s17, %s194_s18  }
   0x4   :  { %190 = dma.done.wait [#allocation3], 1024  }
   0x5   :  { %191 = vsyncadd [#allocation3], 4294966272  ;;  %v161_v0 = vld [vmem:[#allocation2 + $0x38] sm:$0xff]  ;;  %v160_v1 = vld [vmem:[#allocation2 + $0x30] sm:$0xff] }
   0x6   :  { %101 = vmatpush.bf16.msra.mxu0 %v161_v0  ;;  %v159_v2 = vld [vmem:[#allocation2 + $0x28] sm:$0xff]  ;;  %v158_v3 = vld [vmem:[#allocation2 + $0x20] sm:$0xff]  ;;  %v157_v4 = vld [vmem:[#allocation2 + $0x18] sm:$0xff] }
   0x7   :  { %v156_v5 = vld [vmem:[#allocation2 + $0x10] sm:$0xff]  ;;  %v155_v6 = vld [vmem:[#allocation2 + $0x8] sm:$0xff]  ;;  %v154_v7 = vld [vmem:[#allocation2] sm:$0xff] }
   0x8   :  { %v30_v8 = vld [vmem:[%s233_s0] sm:$0xff]  ;;  %v31_v9 = vld [vmem:[%s233_s0 + $0x8] sm:$0xff] }
   0x9   :  { %v32_v10 = vpack.c.bf16 %v31_v9, %v30_v8  ;;  %v165_v11 = vld [vmem:[%s235_s2] ss:$0 sm:$0xff] }
   0xa   :  { %102 = vmatpush.bf16.msra.mxu0 %v160_v1 }
   0xe   :  { %103 = vmatpush.bf16.msra.mxu0 %v159_v2 }
  0x12   :  { %104 = vmatpush.bf16.msra.mxu0 %v158_v3 }
  0x16   :  { %105 = vmatpush.bf16.msra.mxu0 %v157_v4 }
  0x1a   :  { %106 = vmatpush.bf16.msra.mxu0 %v156_v5 }
  0x1e   :  { %107 = vmatpush.bf16.msra.mxu0 %v155_v6 }
  0x22   :  { %108 = vmatpush.bf16.msra.mxu0 %v154_v7 }
  0x25   :  { %109 = vmatmul.bf16.vlgmr.msra.gmra.mxu0 %v32_v10 }
  0xa2   :  { %v110_v12 = vpop.f32.mrf.mxu0 }
  0xa3   :  { %v111_v13 = vadd.f32 %v165_v11, %v110_v12 }
  0xa5   :  { %115 = vst [vmem:[%s236_s3] sm:$0xff] %v111_v13 }
  0xaa   :  { %v112_v14 = vpop.f32.mrf.mxu0 }
  0xab   :  { %v113_v15 = vadd.f32 %v165_v11, %v112_v14 }
  0xad   :  { %116 = vst [vmem:[%s236_s3 + $0x8] sm:$0xff] %v113_v15 }
  0xae   :  { %121 = vsyncpa [#allocation3], 1 }

// kernel: seq2seq_forward.3
= control target key start
LH: loop header
LB: loop body
LE: loop exit
PB: predicated region body
PF: predicated region fallthrough
CT: control target
= control target key end

     0   :  { %14 = vsyncpa [#allocation5], 0  ;;  %s1875_s0 = inlined_call_operand.vmem [shape: f32[2,8,128], index: 0, kind: input, shape index: {}]   ;;  %s1876_s1 = inlined_call_operand.vmem [shape: bf16[128,128], index: 1, kind: input, shape index: {}]   ;;  %s1877_s2 = inlined_call_operand.vmem [shape: f32[1,128], index: 2, kind: input, shape index: {}]   ;;  %s1878_s3 = inlined_call_operand.vmem [shape: bf16[128,128], index: 3, kind: input, shape index: {}]   ;;  %s1879_s4 = inlined_call_operand.vmem [shape: f32[1,128], index: 4, kind: input, shape index: {}]   ;;  %s1880_s5 = inlined_call_operand.hbm [shape: bf16[2,3,128,256], index: 5, kind: input, shape index: {}]   ;;  %s1881_s6 = inlined_call_operand.vmem [shape: f32[2,1,256], index: 6, kind: input, shape index: {}]   ;;  %s1882_s7 = inlined_call_operand.vmem [shape: f32[2,8,128], index: 7, kind: output, shape index: {0}]   ;;  %s1883_s8 = inlined_call_operand.vmem [shape: f32[2,8,128], index: 8, kind: output, shape index: {1}]  }
   0x1   :  { %16 = vsyncpa [#allocation5 + $0x1], 0  ;;  %s1592_s27 = smov 0   ;;  %s1594_s28 = smov 0  }
   0x2   :  { %s1596_s29 = smov 0   ;;  %s1598_s30 = smov 0  }
   0x3 LB: > { %s1611_s9 = sadd.s32 4294967295, %s1542_s30   ;;  %s1614_s10 = sadd.s32 1, %s1542_s30   ;;  %s1542_s30 = sphi %s1598_s30, %s1889_s30   ;;  %s1538_s29 = sphi %s1596_s29, %s1888_s29   ;;  %s1534_s28 = sphi %s1594_s28, %s1887_s28   ;;  %s1530_s27 = sphi %s1592_s27, %s1886_s27  }
   0x4   : > { %s131_s11 = ssub.s32 %s1542_s30, %s1614_s10  ;;  %s134_s12 = sadd.s32 1, %s1538_s29 }
   0x5   : > { %p132_p0 = scmp.eq.s32.totalorder %s131_s11, 0  ;;  %p141_p1 = scmp.ne.s32.totalorder %s1538_s29, %s1534_s28 }
   0x6   : > { %p142_p2 = scmp.eq.s32.totalorder %s1542_s30, 0  ;;  %p147_p3 = scmp.ne.s32.totalorder %s1534_s28, %s1530_s27 }
   0x7   : > { %s1624_s13 = scalar_select %p132_p0, %s1538_s29, %s134_s12  }
   0x8   : > { %p143_p4 = por %p142_p2, %p141_p1  ;;  %p148_p5 = scmp.eq.s32.totalorder %s1611_s9, 0 }
   0x9   : > { %p1432_p6 = scmp.lt.s32.totalorder %s1542_s30, 2  ;;  %s254_s15 = sand.u32 1, %s1538_s29  }
   0xa   : > { %p1628_p7 = por %p148_p5, %p147_p3  ;;  %s1423_s16 = smul.u32 384, %s254_s15 }
   0xb   : > { %s1424_s17 = smul.u32 384, %s1542_s30  ;;  %p1634_p8 = pnand %p1432_p6, %p143_p4 }
   0xc   : > { %s258_s22 = scalar_lea.vmem [#allocation4], %s1423_s16  ;;  %p1063_p9 = scmp.ge.s32.totalorder %s1542_s30, 1 }
   0xd   : > { %s263_s21 = scalar_lea.hbm %s1880_s5, %s1424_s17  ;;  %s266_s23 = sshll.u32 %s258_s22, 4  ;;  %s267_s23 = int_to_ptr.vmem [resolvable:$true] %s266_s23 }
   0xe   : > { %s264_s24 = sshll.u32 %s263_s21, 4  ;;  %s255_s25 = scalar_lea.sflag [#allocation5], %s254_s15  ;;  %s265_s24 = int_to_ptr.hbm [resolvable:$true] %s264_s24 }
   0xf   : > { %s1478_s26 = sshra.s32 %s265_s24, 4  ;;  %p1482_p11 = pneg %p1634_p8  ;;  %s1479_s26 = int_to_ptr.hbm [resolvable:$true] %s1478_s26 }
  0x10   : > { %s1480_s27 = scalar_lea.hbm %s1479_s26, 384  ;;  %s1485_s19 = scalar_lea.hbm %s1880_s5, 768 }
  0x11   : > { %p1481_p10 = scmp.ne.s32.totalorder %s1479_s26, %s1480_s27  ;;  %p1486_p0 = scmp.lt.s32.totalorder %s1479_s26, %s1880_s5 }
  0x12   : > { %p1487_p1 = scmp.lt.s32.totalorder %s1485_s19, %s1480_s27 }
  0x13   : > { %p1483_p12 = pnand %p1482_p11, %p1481_p10 }
  0x14   : > { %p1488_p2 = por %p1487_p1, %p1486_p0 }
  0x15   : > { %p1484_p13 = pneg %p1483_p12 }
  0x17   : > { %p1489_p3 = pnand %p1488_p2, %p1484_p13 }
  0x19   : > { %1492 = shalt.err (!%p1489_p3)
}
  0x1a   : > { %s1544_s15 = smov 128   ;;  %s1545_s20 = smov 8  }
  0x1b   : > { %1431 = dma.hbm_to_vmem [thread:$0]  (!%p1634_p8), %s265_s24, 6144, %s267_s23, %s255_s25, %s1544_s15, %s1544_s15, %s1545_s20  }
  0x1c   : > { %p281_p4 = scmp.lt.s32.totalorder %s1542_s30, 3 }
  0x1e   : > { %p282_p5 = pnand %p1063_p9, %p281_p4 }
  0x1f   : > { %s287_s21 = sand.u32 (!%p282_p5), 1, %s1534_s28  }
  0x20   : > { %285 = sbr.rel (%p282_p5) target bundleno = 627 (0x273), region = 48  ;;  %s288_s26 = scalar_lea.sflag (!%p282_p5), [#allocation5], %s287_s21 }
  0x21   : > { %s1425_s22 = smul.u32 (!%p282_p5), 384, %s287_s21 }
  0x23   : > { %s1656_s27 = scalar_lea.vmem (!%p282_p5), [#allocation4], %s1425_s22 }
  0x25   : > { %1525 = dma.done.wait (%p1628_p7), %s288_s26, 6144  }
  0x26   : > { %1527 = vsyncadd (%p1628_p7), %s288_s26, 4294961152  ;;  %p324_p6 = scmp.lt.s32.totalorder %s1611_s9, 1  ;;  %p1065_p8 = scmp.ne.s32.totalorder %s1611_s9, 0 }
  0x28   : > { %s325_s18 = scalar_select %p324_p6, %s1611_s9, 1 }
  0x29   : > { %331 = sbr.rel (%p1065_p8) target bundleno = 215 (0xd7), region = 56 }
  0x2a   : > { %s1064_s23 = sshll.u32 %s325_s18, 1 }
  0x2b   : > { %s1667_s25 = scalar_lea.vmem %s1881_s6, %s1064_s23 }
  0x2e   : > { %v1366_v0 = vld [vmem:[%s1876_s1 + $0x38] sm:$0xff]  ;;  %v1365_v1 = vld [vmem:[%s1876_s1 + $0x30] sm:$0xff]  ;;  %v1364_v2 = vld [vmem:[%s1876_s1 + $0x28] sm:$0xff]  ;;  %v1546_v15 = vmov 0.0  }
  0x2f   : > { %410 = vmatpush.bf16.msra.mxu0 %v1366_v0  ;;  %v1363_v3 = vld [vmem:[%s1876_s1 + $0x20] sm:$0xff]  ;;  %v1362_v4 = vld [vmem:[%s1876_s1 + $0x18] sm:$0xff]  ;;  %v1361_v5 = vld [vmem:[%s1876_s1 + $0x10] sm:$0xff]  ;;  %426 = vst [vmem:[#allocation3] sm:$0xff] %v1546_v15 }
  0x30   : > { %v332_v6 = vld [vmem:[%s1875_s0] sm:$0xff]  ;;  %v333_v7 = vld [vmem:[%s1875_s0 + $0x8] sm:$0xff]  ;;  %427 = vst [vmem:[#allocation3 + $0x8] sm:$0x3] %v1546_v15 }
  0x31   : > { %v334_v8 = vpack.c.bf16 %v332_v6, %v332_v6  ;;  %v335_v9 = vpack.c.bf16 %v333_v7, %v333_v7  ;;  %v1360_v10 = vld [vmem:[%s1876_s1 + $0x8] sm:$0xff]  ;;  %v1359_v13 = vld [vmem:[%s1876_s1] sm:$0xff]  ;;  %428 = vst [vmem:[#allocation3 + $0x10] sm:$0xff] %v1546_v15 }
  0x32   : > { %429 = vst [vmem:[#allocation3 + $0x18] sm:$0x3] %v1546_v15  ;;  %v1468_v16 = vld [vmem:[%s1877_s2] ss:$0 sm:$0xff] }
  0x33   : > { %411 = vmatpush.bf16.msra.mxu0 %v1365_v1  ;;  %v358_v11 = vunpack.c.l.b16 %v334_v8  ;;  %v359_v12 = vunpack.c.l.b16 %v335_v9 }
  0x35   : > { %v360_v14 = vpack.c.b16 %v359_v12, %v358_v11 }
  0x37   : > { %412 = vmatpush.bf16.msra.mxu0 %v1364_v2 }
  0x3b   : > { %413 = vmatpush.bf16.msra.mxu0 %v1363_v3 }
  0x3f   : > { %414 = vmatpush.bf16.msra.mxu0 %v1362_v4 }
  0x43   : > { %415 = vmatpush.bf16.msra.mxu0 %v1361_v5 }
  0x47   : > { %416 = vmatpush.bf16.msra.mxu0 %v1360_v10 }
  0x4b   : > { %417 = vmatpush.bf16.msra.mxu0 %v1359_v13 }
  0x4e   : > { %418 = vmatmul.bf16.vlgmr.msra.gmra.mxu0 %v360_v14 }
  0xcb   : > { %v419_v17 = vpop.f32.mrf.mxu0 }
  0xcc   : > { %v420_v18 = vadd.f32 %v1468_v16, %v419_v17 }
  0xce   : > { %424 = vst [vmem:[#allocation2] sm:$0xff] %v420_v18 }
  0xd3   : > { %v421_v19 = vpop.f32.mrf.mxu0 }
  0xd4   : > { %v422_v20 = vadd.f32 %v1468_v16, %v421_v19 }
  0xd6   : > { %425 = vst [vmem:[#allocation2 + $0x8] sm:$0xff] %v422_v20 }
  0xd7 PF: > { %v1397_v21 = vld [vmem:[%s1656_s27 + $0xf4] sm:$0xf]  ;;  %v1174_v22 = vld [vmem:[%s1656_s27 + $0xf8] sm:$0xf0]  ;;  %v1395_v26 = vld [vmem:[%s1656_s27 + $0xe4] sm:$0xf] }
  0xd8   : > { %v1381_v23 = vld [vmem:[%s1656_s27 + $0x74] sm:$0xf]  ;;  %v1177_v24 = vor.u32 %v1397_v21, %v1174_v22  ;;  %v1238_v25 = vld [vmem:[%s1656_s27 + $0x78] sm:$0xf0]  ;;  %v1166_v27 = vld [vmem:[%s1656_s27 + $0xe8] sm:$0xf0] }
  0xd9   : > { %v1241_v28 = vor.u32 %v1381_v23, %v1238_v25  ;;  %v1379_v29 = vld [vmem:[%s1656_s27 + $0x64] sm:$0xf]  ;;  %v1230_v30 = vld [vmem:[%s1656_s27 + $0x68] sm:$0xf0]  ;;  %v1172_v31 = vld [vmem:[%s1656_s27 + $0xf0] sm:$0xf]  ;;  %v1169_v32 = vor.u32 %v1395_v26, %v1166_v27 }
  0xda   : > { %575 = vmatpush.bf16.msra.mxu1 %v1177_v24  ;;  %v1398_v33 = vld [vmem:[%s1656_s27 + $0xf4] sm:$0xf0]  ;;  %v1233_v34 = vor.u32 %v1379_v29, %v1230_v30  ;;  %v1393_v36 = vld [vmem:[%s1656_s27 + $0xd4] sm:$0xf]  ;;  %v1158_v37 = vld [vmem:[%s1656_s27 + $0xd8] sm:$0xf0] }
  0xdb   : > { %689 = vmatpush.bf16.msra.mxu3 %v1241_v28  ;;  %v1173_v35 = vor.u32 %v1398_v33, %v1172_v31  ;;  %v1164_v38 = vld [vmem:[%s1656_s27 + $0xe0] sm:$0xf]  ;;  %v1377_v39 = vld [vmem:[%s1656_s27 + $0x54] sm:$0xf]  ;;  %v1222_v40 = vld [vmem:[%s1656_s27 + $0x58] sm:$0xf0]  ;;  %v1161_v43 = vor.u32 %v1393_v36, %v1158_v37 }
  0xdc   : > { %v1396_v41 = vld [vmem:[%s1656_s27 + $0xe4] sm:$0xf0]  ;;  %v1156_v44 = vld [vmem:[%s1656_s27 + $0xd0] sm:$0xf]  ;;  %v1394_v45 = vld [vmem:[%s1656_s27 + $0xd4] sm:$0xf0]  ;;  %v1225_v46 = vor.u32 %v1377_v39, %v1222_v40 }
  0xdd   : > { %561 = vmatpush.bf16.msra.mxu0 %v1173_v35  ;;  %v1165_v42 = vor.u32 %v1396_v41, %v1164_v38  ;;  %v1391_v47 = vld [vmem:[%s1656_s27 + $0xc4] sm:$0xf]  ;;  %v1150_v48 = vld [vmem:[%s1656_s27 + $0xc8] sm:$0xf0]  ;;  %v1157_v51 = vor.u32 %v1394_v45, %v1156_v44  ;;  %v1148_v53 = vld [vmem:[%s1656_s27 + $0xc0] sm:$0xf] }
  0xde   : > { %576 = vmatpush.bf16.msra.mxu1 %v1169_v32  ;;  %v1375_v49 = vld [vmem:[%s1656_s27 + $0x44] sm:$0xf]  ;;  %v1214_v50 = vld [vmem:[%s1656_s27 + $0x48] sm:$0xf0]  ;;  %v1153_v52 = vor.u32 %v1391_v47, %v1150_v48  ;;  %v1392_v54 = vld [vmem:[%s1656_s27 + $0xc4] sm:$0xf0] }
  0xdf   : > { %690 = vmatpush.bf16.msra.mxu3 %v1233_v34  ;;  %v1217_v55 = vor.u32 %v1375_v49, %v1214_v50  ;;  %v1389_v56 = vld [vmem:[%s1656_s27 + $0xb4] sm:$0xf]  ;;  %v1142_v57 = vld [vmem:[%s1656_s27 + $0xb8] sm:$0xf0]  ;;  %v1236_v60 = vld [vmem:[%s1656_s27 + $0x70] sm:$0xf]  ;;  %v1149_v62 = vor.u32 %v1392_v54, %v1148_v53 }
  0xe0   : > { %v1373_v58 = vld [vmem:[%s1656_s27 + $0x34] sm:$0xf]  ;;  %v1206_v59 = vld [vmem:[%s1656_s27 + $0x38] sm:$0xf0]  ;;  %v1382_v61 = vld [vmem:[%s1656_s27 + $0x74] sm:$0xf0]  ;;  %v1145_v1 = vor.u32 %v1389_v56, %v1142_v57 }
  0xe1   : > { %562 = vmatpush.bf16.msra.mxu0 %v1165_v42  ;;  %v1387_v63 = vld [vmem:[%s1656_s27 + $0xa4] sm:$0xf]  ;;  %v1237_v0 = vor.u32 %v1382_v61, %v1236_v60  ;;  %v1134_v2 = vld [vmem:[%s1656_s27 + $0xa8] sm:$0xf0]  ;;  %v1140_v3 = vld [vmem:[%s1656_s27 + $0xb0] sm:$0xf]  ;;  %v1209_v5 = vor.u32 %v1373_v58, %v1206_v59 }
  0xe2   : > { %577 = vmatpush.bf16.msra.mxu1 %v1161_v43  ;;  %v1390_v4 = vld [vmem:[%s1656_s27 + $0xb4] sm:$0xf0]  ;;  %v1371_v6 = vld [vmem:[%s1656_s27 + $0x24] sm:$0xf]  ;;  %v1198_v7 = vld [vmem:[%s1656_s27 + $0x28] sm:$0xf0]  ;;  %v1137_v15 = vor.u32 %v1387_v63, %v1134_v2 }
  0xe3   : > { %691 = vmatpush.bf16.msra.mxu3 %v1225_v46  ;;  %675 = vmatpush.bf16.msra.mxu2 %v1237_v0  ;;  %v1228_v8 = vld [vmem:[%s1656_s27 + $0x60] sm:$0xf]  ;;  %v1380_v9 = vld [vmem:[%s1656_s27 + $0x64] sm:$0xf0]  ;;  %v1741_v10 = vld [vmem:[#allocation2] sm:$0xff]  ;;  %v1141_v12 = vor.u32 %v1390_v4, %v1140_v3  ;;  %v1201_v18 = vor.u32 %v1371_v6, %v1198_v7  ;;  %p1324_p7 = scmp.ne.s32.totalorder %s1611_s9, 1 }
  0xe4   : > { %v1743_v11 = vld [vmem:[#allocation2 + $0x8] sm:$0xff]  ;;  %v1385_v13 = vld [vmem:[%s1656_s27 + $0x94] sm:$0xf]  ;;  %v1229_v14 = vor.u32 %v1380_v9, %v1228_v8  ;;  %432 = vst [vmem:[#allocation3 + $0x1] sm:$0xff] %v1741_v10  ;;  %v1132_v16 = vld [vmem:[%s1656_s27 + $0xa0] sm:$0xf]  ;;  %v456_v26 = vpack.c.bf16 %v1741_v10, %v1741_v10 }
  0xe5   : > { %563 = vmatpush.bf16.msra.mxu0 %v1157_v51  ;;  %v1388_v17 = vld [vmem:[%s1656_s27 + $0xa4] sm:$0xf0]  ;;  %433 = vst [vmem:[#allocation3 + $0x11] sm:$0xff] %v1743_v11  ;;  %v1126_v19 = vld [vmem:[%s1656_s27 + $0x98] sm:$0xf0]  ;;  %v457_v27 = vpack.c.bf16 %v1743_v11, %v1743_v11 }
  0xe6   : > { %578 = vmatpush.bf16.msra.mxu1 %v1153_v52  ;;  %v1220_v20 = vld [vmem:[%s1656_s27 + $0x50] sm:$0xf]  ;;  %v1378_v21 = vld [vmem:[%s1656_s27 + $0x54] sm:$0xf0]  ;;  %v1369_v22 = vld [vmem:[%s1656_s27 + $0x14] sm:$0xf]  ;;  %v1133_v25 = vor.u32 %v1388_v17, %v1132_v16  ;;  %v1129_v30 = vor.u32 %v1385_v13, %v1126_v19  ;;  %v477_v45 = vunpack.c.l.b16 %v456_v26 }
  0xe7   : > { %692 = vmatpush.bf16.msra.mxu3 %v1217_v55  ;;  %676 = vmatpush.bf16.msra.mxu2 %v1229_v14  ;;  %v1190_v23 = vld [vmem:[%s1656_s27 + $0x18] sm:$0xf0]  ;;  %v1221_v24 = vor.u32 %v1378_v21, %v1220_v20  ;;  %v1212_v28 = vld [vmem:[%s1656_s27 + $0x40] sm:$0xf]  ;;  %v1376_v29 = vld [vmem:[%s1656_s27 + $0x44] sm:$0xf0]  ;;  %v478_v46 = vunpack.c.l.b16 %v457_v27 }
  0xe8   : > { %v1383_v31 = vld [vmem:[%s1656_s27 + $0x84] sm:$0xf]  ;;  %v1124_v32 = vld [vmem:[%s1656_s27 + $0x90] sm:$0xf]  ;;  %v1386_v33 = vld [vmem:[%s1656_s27 + $0x94] sm:$0xf0]  ;;  %v1193_v34 = vor.u32 %v1369_v22, %v1190_v23  ;;  %v1213_v38 = vor.u32 %v1376_v29, %v1212_v28 }
  0xe9   : > { %564 = vmatpush.bf16.msra.mxu0 %v1149_v62  ;;  %v1118_v35 = vld [vmem:[%s1656_s27 + $0x88] sm:$0xf0]  ;;  %v1367_v36 = vld [vmem:[%s1656_s27 + $0x4] sm:$0xf]  ;;  %v1413_v39 = vld [vmem:[%s1656_s27 + $0x174] sm:$0xf]  ;;  %v1125_v42 = vor.u32 %v1386_v33, %v1124_v32  ;;  %v479_v63 = vpack.c.b16 %v478_v46, %v477_v45 }
  0xea   : > { %579 = vmatpush.bf16.msra.mxu1 %v1145_v1  ;;  %v1182_v37 = vld [vmem:[%s1656_s27 + $0x8] sm:$0xf0]  ;;  %v1318_v40 = vld [vmem:[%s1656_s27 + $0x178] sm:$0xf0]  ;;  %v1204_v47 = vld [vmem:[%s1656_s27 + $0x30] sm:$0xf]  ;;  %v1121_v49 = vor.u32 %v1383_v31, %v1118_v35 }
  0xeb   : > { %693 = vmatpush.bf16.msra.mxu3 %v1209_v5  ;;  %677 = vmatpush.bf16.msra.mxu2 %v1221_v24  ;;  %v434_v41 = vld [vmem:[#allocation3] sm:$0xff]  ;;  %v1374_v48 = vld [vmem:[%s1656_s27 + $0x34] sm:$0xf0]  ;;  %v1384_v52 = vld [vmem:[%s1656_s27 + $0x84] sm:$0xf0]  ;;  %v1185_v53 = vor.u32 %v1367_v36, %v1182_v37  ;;  %v1321_v54 = vor.u32 %v1413_v39, %v1318_v40 }
  0xec   : > { %v435_v43 = vld [vmem:[#allocation3 + $0x10] sm:$0xff]  ;;  %v436_v44 = vpack.c.bf16 %v434_v41, %v434_v41  ;;  %v1116_v51 = vld [vmem:[%s1656_s27 + $0x80] sm:$0xf]  ;;  %v1414_v57 = vld [vmem:[%s1656_s27 + $0x174] sm:$0xf0]  ;;  %v1205_v61 = vor.u32 %v1374_v48, %v1204_v47 }
  0xed   : > { %565 = vmatpush.bf16.msra.mxu0 %v1141_v12  ;;  %v437_v50 = vpack.c.bf16 %v435_v43, %v435_v43  ;;  %v1316_v56 = vld [vmem:[%s1656_s27 + $0x170] sm:$0xf]  ;;  %v1411_v59 = vld [vmem:[%s1656_s27 + $0x164] sm:$0xf]  ;;  %v1310_v60 = vld [vmem:[%s1656_s27 + $0x168] sm:$0xf0]  ;;  %v1117_v62 = vor.u32 %v1384_v52, %v1116_v51 }
  0xee   : > { %580 = vmatpush.bf16.msra.mxu1 %v1137_v15  ;;  %v591_v55 = vunpack.c.l.b16 %v436_v44  ;;  %v1196_v0 = vld [vmem:[%s1656_s27 + $0x20] sm:$0xf]  ;;  %v1372_v1 = vld [vmem:[%s1656_s27 + $0x24] sm:$0xf0]  ;;  %v1317_v3 = vor.u32 %v1414_v57, %v1316_v56  ;;  %v1313_v4 = vor.u32 %v1411_v59, %v1310_v60  ;;  %v1409_v7 = vld [vmem:[%s1656_s27 + $0x154] sm:$0xf] }
  0xef   : > { %694 = vmatpush.bf16.msra.mxu3 %v1201_v18  ;;  %678 = vmatpush.bf16.msra.mxu2 %v1213_v38  ;;  %v592_v58 = vunpack.c.l.b16 %v437_v50  ;;  %v1308_v5 = vld [vmem:[%s1656_s27 + $0x160] sm:$0xf]  ;;  %v1412_v6 = vld [vmem:[%s1656_s27 + $0x164] sm:$0xf0]  ;;  %v1302_v8 = vld [vmem:[%s1656_s27 + $0x158] sm:$0xf0]  ;;  %v1197_v9 = vor.u32 %v1372_v1, %v1196_v0 }
  0xf0   : > { %v1188_v12 = vld [vmem:[%s1656_s27 + $0x10] sm:$0xf]  ;;  %v1370_v13 = vld [vmem:[%s1656_s27 + $0x14] sm:$0xf0]  ;;  %v1309_v14 = vor.u32 %v1412_v6, %v1308_v5  ;;  %v1305_v15 = vor.u32 %v1409_v7, %v1302_v8  ;;  %v1407_v18 = vld [vmem:[%s1656_s27 + $0x144] sm:$0xf] }
  0xf1   : > { %566 = vmatpush.bf16.msra.mxu0 %v1133_v25  ;;  %v593_v2 = vpack.c.b16 %v592_v58, %v591_v55  ;;  %v1300_v16 = vld [vmem:[%s1656_s27 + $0x150] sm:$0xf]  ;;  %v1410_v17 = vld [vmem:[%s1656_s27 + $0x154] sm:$0xf0]  ;;  %v1294_v19 = vld [vmem:[%s1656_s27 + $0x148] sm:$0xf0]  ;;  %v1189_v20 = vor.u32 %v1370_v13, %v1188_v12 }
  0xf2   : > { %581 = vmatpush.bf16.msra.mxu1 %v1129_v30  ;;  %v1180_v21 = vld [vmem:[%s1656_s27] sm:$0xf]  ;;  %v1368_v22 = vld [vmem:[%s1656_s27 + $0x4] sm:$0xf0]  ;;  %v1301_v23 = vor.u32 %v1410_v17, %v1300_v16  ;;  %v1297_v24 = vor.u32 %v1407_v18, %v1294_v19  ;;  %v1405_v27 = vld [vmem:[%s1656_s27 + $0x134] sm:$0xf] }
  0xf3   : > { %695 = vmatpush.bf16.msra.mxu3 %v1193_v34  ;;  %679 = vmatpush.bf16.msra.mxu2 %v1205_v61  ;;  %v1292_v25 = vld [vmem:[%s1656_s27 + $0x140] sm:$0xf]  ;;  %v1408_v26 = vld [vmem:[%s1656_s27 + $0x144] sm:$0xf0]  ;;  %v1286_v28 = vld [vmem:[%s1656_s27 + $0x138] sm:$0xf0]  ;;  %v1181_v29 = vor.u32 %v1368_v22, %v1180_v21 }
  0xf4   : > { %v1293_v30 = vor.u32 %v1408_v26, %v1292_v25  ;;  %v1289_v31 = vor.u32 %v1405_v27, %v1286_v28  ;;  %v1284_v32 = vld [vmem:[%s1656_s27 + $0x130] sm:$0xf]  ;;  %v1406_v33 = vld [vmem:[%s1656_s27 + $0x134] sm:$0xf0]  ;;  %v1403_v34 = vld [vmem:[%s1656_s27 + $0x124] sm:$0xf] }
  0xf5   : > { %567 = vmatpush.bf16.msra.mxu0 %v1125_v42  ;;  %v1278_v35 = vld [vmem:[%s1656_s27 + $0x128] sm:$0xf0]  ;;  %v1285_v36 = vor.u32 %v1406_v33, %v1284_v32  ;;  %v1276_v37 = vld [vmem:[%s1656_s27 + $0x120] sm:$0xf]  ;;  %v1404_v39 = vld [vmem:[%s1656_s27 + $0x124] sm:$0xf0] }
  0xf6   : > { %582 = vmatpush.bf16.msra.mxu1 %v1121_v49  ;;  %v1281_v38 = vor.u32 %v1403_v34, %v1278_v35  ;;  %v703_v40 = vld [vmem:[#allocation3 + $0x2] sm:$0xff]  ;;  %v704_v41 = vld [vmem:[#allocation3 + $0x12] sm:$0xff]  ;;  %v1270_v43 = vld [vmem:[%s1656_s27 + $0x118] sm:$0xf0]  ;;  %v1277_v44 = vor.u32 %v1404_v39, %v1276_v37 }
  0xf7   : > { %696 = vmatpush.bf16.msra.mxu3 %v1185_v53  ;;  %680 = vmatpush.bf16.msra.mxu2 %v1197_v9  ;;  %v1401_v42 = vld [vmem:[%s1656_s27 + $0x114] sm:$0xf]  ;;  %v705_v45 = vpack.c.bf16 %v703_v40, %v703_v40  ;;  %v706_v46 = vpack.c.bf16 %v704_v41, %v704_v41  ;;  %v1268_v48 = vld [vmem:[%s1656_s27 + $0x110] sm:$0xf]  ;;  %v1402_v49 = vld [vmem:[%s1656_s27 + $0x114] sm:$0xf0] }
  0xf8   : > { %v1273_v47 = vor.u32 %v1401_v42, %v1270_v43  ;;  %v1399_v50 = vld [vmem:[%s1656_s27 + $0x104] sm:$0xf]  ;;  %v1262_v51 = vld [vmem:[%s1656_s27 + $0x108] sm:$0xf0]  ;;  %v1269_v52 = vor.u32 %v1402_v49, %v1268_v48  ;;  %v1260_v56 = vld [vmem:[%s1656_s27 + $0x100] sm:$0xf] }
  0xf9   : > { %568 = vmatpush.bf16.msra.mxu0 %v1117_v62  ;;  %583 = vmatmul.bf16.vlgmr.msra.gmra.mxu1 %v479_v63  ;;  %v726_v53 = vunpack.c.l.b16 %v705_v45  ;;  %v1265_v55 = vor.u32 %v1399_v50, %v1262_v51  ;;  %v1400_v57 = vld [vmem:[%s1656_s27 + $0x104] sm:$0xf0] }
  0xfa   : > { %824 = vmatpush.bf16.msrb.mxu1 %v1321_v54  ;;  %697 = vmatmul.bf16.vlgmr.msra.gmra.mxu3 %v593_v2  ;;  %v727_v54 = vunpack.c.l.b16 %v706_v46  ;;  %v1261_v59 = vor.u32 %v1400_v57, %v1260_v56 }
  0xfb   : > { %681 = vmatpush.bf16.msra.mxu2 %v1189_v20 }
  0xfc   : > { %569 = vmatmul.bf16.vlgmr.msra.gmra.mxu0 %v479_v63  ;;  %v728_v58 = vpack.c.b16 %v727_v54, %v726_v53  ;;  %v1810_v63 = vld [vmem:[%s1667_s25] sm:$0x3] }
  0xfd   : > { %810 = vmatpush.bf16.msrb.mxu0 %v1317_v3  ;;  %v845_v1 = vperm.slane %v1810_v63, 1  ;;  %v844_v26 = vperm.slane %v1810_v63, 0 }
  0xfe   : > { %825 = vmatpush.bf16.msrb.mxu1 %v1313_v4 }
  0xff   : > { %682 = vmatpush.bf16.msra.mxu2 %v1181_v29 }
 0x101   : > { %811 = vmatpush.bf16.msrb.mxu0 %v1309_v14 }
 0x102   : > { %826 = vmatpush.bf16.msrb.mxu1 %v1305_v15  ;;  %683 = vmatmul.bf16.vlgmr.msra.gmra.mxu2 %v593_v2 }
 0x105   : > { %812 = vmatpush.bf16.msrb.mxu0 %v1301_v23 }
 0x106   : > { %827 = vmatpush.bf16.msrb.mxu1 %v1297_v24 }
 0x109   : > { %813 = vmatpush.bf16.msrb.mxu0 %v1293_v30 }
 0x10a   : > { %828 = vmatpush.bf16.msrb.mxu1 %v1289_v31 }
 0x10d   : > { %814 = vmatpush.bf16.msrb.mxu0 %v1285_v36 }
 0x10e   : > { %829 = vmatpush.bf16.msrb.mxu1 %v1281_v38 }
 0x111   : > { %815 = vmatpush.bf16.msrb.mxu0 %v1277_v44 }
 0x112   : > { %830 = vmatpush.bf16.msrb.mxu1 %v1273_v47 }
 0x115   : > { %816 = vmatpush.bf16.msrb.mxu0 %v1269_v52 }
 0x116   : > { %831 = vmatpush.bf16.msrb.mxu1 %v1265_v55 }
 0x119   : > { %832 = vmatmul.bf16.vlgmr.msrb.gmra.mxu1 %v728_v58  ;;  %817 = vmatpush.bf16.msrb.mxu0 %v1261_v59 }
 0x11c   : > { %818 = vmatmul.bf16.vlgmr.msrb.gmra.mxu0 %v728_v58 }
 0x176   : > { %v584_v60 = vpop.f32.mrf.mxu1 }
 0x179   : > { %v570_v3 = vpop.f32.mrf.mxu0 }
 0x17d   : > { %v698_v62 = vpop.f32.mrf.mxu3 }
 0x17e   : > { %v586_v61 = vpop.f32.mrf.mxu1  ;;  %v699_v0 = vadd.f32 %v698_v62, %v584_v60 }
 0x181   : > { %v572_v13 = vpop.f32.mrf.mxu0 }
 0x185   : > { %v700_v6 = vpop.f32.mrf.mxu3  ;;  %v684_v18 = vpop.f32.mrf.mxu2 }
 0x186   : > { %v701_v8 = vadd.f32 %v700_v6, %v586_v61  ;;  %v685_v23 = vadd.f32 %v684_v18, %v570_v3 }
 0x18d   : > { %v686_v31 = vpop.f32.mrf.mxu2 }
 0x18e   : > { %v687_v35 = vadd.f32 %v686_v31, %v572_v13 }
 0x196   : > { %v833_v2 = vpop.f32.mrf.mxu1 }
 0x197   : > { %v839_v4 = vadd.f32 %v833_v2, %v699_v0 }
 0x199   : > { %v849_v5 = vadd.f32 %v845_v1, %v839_v4  ;;  %v819_v20 = vpop.f32.mrf.mxu0 }
 0x19a   : > { %v838_v28 = vadd.f32 %v819_v20, %v685_v23 }
 0x19b   : > { %v1322_v7 = vmul.f32 -1.442695, %v849_v5 }
 0x19c   : > { %v848_v36 = vadd.f32 %v844_v26, %v838_v28 }
 0x19d   : > { %1469 = vpow2.f32 %v1322_v7 }
 0x19e   : > { %v835_v9 = vpop.f32.mrf.mxu1 }
 0x19f   : > { %v841_v12 = vadd.f32 %v835_v9, %v701_v8 }
 0x1a1   : > { %v851_v14 = vadd.f32 %v845_v1, %v841_v12  ;;  %v821_v38 = vpop.f32.mrf.mxu0 }
 0x1a2   : > { %v840_v43 = vadd.f32 %v821_v38, %v687_v35 }
 0x1a3   : > { %v1470_v15 = vpop.eup %1469  ;;  %v1323_v16 = vmul.f32 -1.442695, %v851_v14 }
 0x1a4   : > { %v858_v17 = vadd.f32 1.0, %v1470_v15  ;;  %v850_v51 = vadd.f32 %v844_v26, %v840_v43 }
 0x1a5   : > { %1471 = vpow2.f32 %v1323_v16 }
 0x1a6   : > { %1473 = vrcp.f32 %v858_v17  ;;  %v871_v27 = vand.u32 2147483648, %v858_v17  ;;  %v869_v30 = vand.u32 2147483647, %v858_v17  ;;  %vm865_vm1 = vweird.f32 %v858_v17 }
 0x1a8   : > { %v872_v34 = vor.u32 1.1754944e-38, %v871_v27  ;;  %vm870_vm3 = vcmp.eq.f32.partialorder %v869_v30, 8.507059e+37 }
 0x1ab   : > { %v1472_v19 = vpop.eup %1471 }
 0x1ac   : > { %v1474_v21 = vpop.eup %1473  ;;  %v859_v22 = vadd.f32 1.0, %v1472_v19 }
 0x1ad   : > { %v861_v24 = vmul.f32 %v1474_v21, %v858_v17  ;;  %vm866_vm0 = vweird.f32 %v1474_v21 }
 0x1ae   : > { %1475 = vrcp.f32 %v859_v22  ;;  %vm867_vm2 = vmor %vm865_vm1, %vm866_vm0  ;;  %v886_v44 = vand.u32 2147483648, %v859_v22  ;;  %v884_v47 = vand.u32 2147483647, %v859_v22  ;;  %vm880_vm5 = vweird.f32 %v859_v22 }
 0x1af   : > { %v862_v25 = vsub.f32 1.0, %v861_v24 }
 0x1b0   : > { %v887_v50 = vor.u32 1.1754944e-38, %v886_v44  ;;  %vm885_vm7 = vcmp.eq.f32.partialorder %v884_v47, 8.507059e+37 }
 0x1b1   : > { %v863_v29 = vmul.f32 %v1474_v21, %v862_v25 }
 0x1b3   : > { %v864_v32 = vadd.f32 %v1474_v21, %v863_v29 }
 0x1b4   : > { %v1476_v33 = vpop.eup %1475 }
 0x1b5   : > { %v868_v37 = vsel %vm867_vm2, %v1474_v21, %v864_v32  ;;  %v876_v39 = vmul.f32 %v1476_v33, %v859_v22  ;;  %vm881_vm4 = vweird.f32 %v1476_v33 }
 0x1b6   : > { %v873_v40 = vsel %vm870_vm3, %v872_v34, %v868_v37  ;;  %vm882_vm6 = vmor %vm880_vm5, %vm881_vm4 }
 0x1b7   : > { %v890_v41 = vmul.f32 %v873_v40, %v848_v36  ;;  %v877_v42 = vsub.f32 1.0, %v876_v39 }
 0x1b9   : > { %v892_v45 = vadd.f32 %v890_v41, %v1741_v10  ;;  %v878_v46 = vmul.f32 %v1476_v33, %v877_v42 }
 0x1bb   : > { %v894_v48 = vmul.f32 0.70710677, %v892_v45  ;;  %v879_v49 = vadd.f32 %v1476_v33, %v878_v46 }
 0x1bd   : > { %896 = vst [vmem:[#allocation2] sm:$0xff] %v894_v48  ;;  %v883_v52 = vsel %vm882_vm6, %v1476_v33, %v879_v49 }
 0x1be   : > { %v888_v53 = vsel %vm885_vm7, %v887_v50, %v883_v52 }
 0x1bf   : > { %v891_v54 = vmul.f32 %v888_v53, %v850_v51 }
 0x1c1   : > { %v893_v55 = vadd.f32 %v891_v54, %v1743_v11  ;;  %901 = sbr.rel (%p1324_p7) target bundleno = 627 (0x273), region = 60 }
 0x1c3   : > { %v895_v56 = vmul.f32 0.70710677, %v893_v55 }
 0x1c5   : > { %897 = vst [vmem:[#allocation2 + $0x8] sm:$0xff] %v895_v56 }
 0x1c6   : > { %v1422_v10 = vld [vmem:[%s1878_s3 + $0x38] sm:$0xff]  ;;  %v1421_v57 = vld [vmem:[%s1878_s3 + $0x30] sm:$0xff]  ;;  %v1420_v58 = vld [vmem:[%s1878_s3 + $0x28] sm:$0xff]  ;;  %v902_v61 = vpack.c.bf16 %v894_v48, %v894_v48  ;;  %v903_v62 = vpack.c.bf16 %v895_v56, %v895_v56 }
 0x1c7   : > { %978 = vmatpush.bf16.msra.mxu0 %v1422_v10  ;;  %v1419_v11 = vld [vmem:[%s1878_s3 + $0x20] sm:$0xff]  ;;  %v1418_v59 = vld [vmem:[%s1878_s3 + $0x18] sm:$0xff]  ;;  %v1417_v60 = vld [vmem:[%s1878_s3 + $0x10] sm:$0xff] }
 0x1c8   : > { %v1416_v63 = vld [vmem:[%s1878_s3 + $0x8] sm:$0xff]  ;;  %v926_v0 = vunpack.c.l.b16 %v902_v61  ;;  %v927_v1 = vunpack.c.l.b16 %v903_v62  ;;  %v1415_v2 = vld [vmem:[%s1878_s3] sm:$0xff] }
 0x1c9   : > { %v1477_v4 = vld [vmem:[%s1879_s4] ss:$0 sm:$0xff]  ;;  %v995_v13 = vld [vmem:[%s1875_s0 + $0x8] sm:$0xff] }
 0x1ca   : > { %v928_v3 = vpack.c.b16 %v927_v1, %v926_v0  ;;  %v994_v6 = vld [vmem:[%s1875_s0] sm:$0xff] }
 0x1cb   : > { %979 = vmatpush.bf16.msra.mxu0 %v1421_v57 }
 0x1cf   : > { %980 = vmatpush.bf16.msra.mxu0 %v1420_v58 }
 0x1d3   : > { %981 = vmatpush.bf16.msra.mxu0 %v1419_v11 }
 0x1d7   : > { %982 = vmatpush.bf16.msra.mxu0 %v1418_v59 }
 0x1db   : > { %983 = vmatpush.bf16.msra.mxu0 %v1417_v60 }
 0x1df   : > { %984 = vmatpush.bf16.msra.mxu0 %v1416_v63 }
 0x1e3   : > { %985 = vmatpush.bf16.msra.mxu0 %v1415_v2 }
 0x1e6   : > { %986 = vmatmul.bf16.vlgmr.msra.gmra.mxu0 %v928_v3 }
 0x263   : > { %v987_v5 = vpop.f32.mrf.mxu0 }
 0x264   : > { %v988_v7 = vadd.f32 %v1477_v4, %v987_v5 }
 0x266   : > { %992 = vst [vmem:[%s1882_s7] sm:$0xff] %v988_v7  ;;  %v996_v8 = vadd.f32 %v994_v6, %v988_v7 }
 0x268   : > { %v998_v9 = vmul.f32 0.70710677, %v996_v8 }
 0x26a   : > { %1000 = vst [vmem:[%s1883_s8] sm:$0xff] %v998_v9 }
 0x26b   : > { %v989_v12 = vpop.f32.mrf.mxu0 }
 0x26c   : > { %v990_v14 = vadd.f32 %v1477_v4, %v989_v12 }
 0x26e   : > { %993 = vst [vmem:[%s1882_s7 + $0x8] sm:$0xff] %v990_v14  ;;  %v997_v15 = vadd.f32 %v995_v13, %v990_v14 }
 0x270   : > { %v999_v16 = vmul.f32 0.70710677, %v997_v15 }
 0x272   : > { %1001 = vst [vmem:[%s1883_s8 + $0x8] sm:$0xff] %v999_v16 }
 0x273 PF: > { %p19_p9 = scmp.ge.s32.totalorder %s1614_s10, 4   ;;  %s1886_s27 = smov %s1534_s28 }
 0x274   : > { %s1887_s28 = smov %s1538_s29  ;;  %s1888_s29 = smov %s1624_s13 }
 0x275   : > { %s1889_s30 = smov %s1614_s10  ;;  %21 = sbr.rel (!%p19_p9) target bundleno = 3 (0x3), region = 105 }
 0x27a   :  { %1019 = vsyncpa [#allocation5], 1 }
 0x27b   :  { %1021 = vsyncpa [#allocation5 + $0x1], 1 }

// kernel: seq2seq_forward.4
= control target key start
LH: loop header
LB: loop body
LE: loop exit
PB: predicated region body
PF: predicated region fallthrough
CT: control target
= control target key end

     0   :  { %s2669_s0 = inlined_call_operand.vmem [shape: f32[2,8,128], index: 0, kind: input, shape index: {}]   ;;  %s2670_s1 = inlined_call_operand.vmem [shape: f32[2,8,128], index: 1, kind: input, shape index: {}]   ;;  %s2671_s2 = inlined_call_operand.vmem [shape: f32[2,8,128], index: 2, kind: input, shape index: {}]   ;;  %s2672_s3 = inlined_call_operand.vmem [shape: bf16[128,128], index: 3, kind: input, shape index: {}]   ;;  %s2673_s4 = inlined_call_operand.vmem [shape: f32[1,128], index: 4, kind: input, shape index: {}]   ;;  %s2674_s5 = inlined_call_operand.hbm [shape: bf16[2,3,128,256], index: 5, kind: input, shape index: {}]   ;;  %s2675_s6 = inlined_call_operand.vmem [shape: f32[2,1,256], index: 6, kind: input, shape index: {}]   ;;  %s2676_s7 = inlined_call_operand.vmem [shape: bf16[128,128], index: 7, kind: input, shape index: {}]   ;;  %s2677_s8 = inlined_call_operand.vmem [shape: f32[1,128], index: 8, kind: input, shape index: {}]   ;;  %s2678_s9 = inlined_call_operand.vmem [shape: bf16[128,128], index: 9, kind: input, shape index: {}]   ;;  %s2679_s10 = inlined_call_operand.vmem [shape: f32[1,128], index: 10, kind: input, shape index: {}]   ;;  %s2680_s11 = inlined_call_operand.hbm [shape: bf16[128,128], index: 11, kind: input, shape index: {}]   ;;  %s2681_s12 = inlined_call_operand.vmem [shape: f32[1,128], index: 12, kind: input, shape index: {}]   ;;  %s2682_s13 = inlined_call_operand.vmem [shape: f32[2,8,128], index: 13, kind: output, shape index: {0}]   ;;  %s2683_s14 = inlined_call_operand.hbm [shape: f32[2,8,8], index: 14, kind: output, shape index: {1}]  }
   0x1   :  { %2686 = sst [smem:[#allocation15_spill]] %s2680_s11 }
   0x2   :  { %2687 = sst [smem:[#allocation16_spill]] %s2681_s12 }
   0x3   :  { %2688 = sst [smem:[#allocation17_spill]] %s2682_s13 }
   0x4   :  { %2689 = sst [smem:[#allocation18_spill]] %s2683_s14 }
   0x5   :  { %20 = vsyncpa [#allocation5], 0 }
   0x6   :  { %22 = vsyncpa [#allocation5 + $0x1], 0 }
   0x7   :  { %23 = vsyncpa [#allocation8], 0 }
   0x8   :  { %24 = vsyncpa [#allocation6], 0  ;;  %s2309_s29 = smov 0   ;;  %s2311_s30 = smov 0  }
   0x9   :  { %s2313_s15 = smov 0   ;;  %s2315_s16 = smov 0  }
   0xa LB: > { %2690 = sst [smem:[#allocation13_spill]] %s2219_s15  ;;  %s2328_s17 = sadd.s32 4294967295, %s2223_s16   ;;  %s2223_s16 = sphi %s2315_s16, %s2703_s16   ;;  %s2219_s15 = sphi %s2313_s15, %s2700_s15   ;;  %s2215_s30 = sphi %s2311_s30, %s2702_s30   ;;  %s2211_s29 = sphi %s2309_s29, %s2701_s29  }
   0xb   : > { %p155_p0 = scmp.ne.s32.totalorder %s2215_s30, %s2211_s29  ;;  %p156_p1 = scmp.eq.s32.totalorder %s2328_s17, 0 }
   0xc   : > { %p1557_p2 = scmp.ge.s32.totalorder %s2223_s16, 1  ;;  %p360_p3 = scmp.lt.s32.totalorder %s2223_s16, 3 }
   0xd   : > { %p1558_p4 = scmp.ne.s32.totalorder %s2328_s17, 0  ;;  %p2337_p5 = por %p156_p1, %p155_p0 }
   0xe   : > { %s2692_s11 = sld [smem:[#allocation15_spill]]  ;;  %p2344_p6 = pnand %p1557_p2, %p360_p3 }
   0xf   : > { %s2225_s23 = smov [#allocation7]   ;;  %s2353_s25 = sadd.s32 1, %s2223_s16  }
  0x10   : > { %p2019_p7 = pneg %p2344_p6  ;;  %s400_s24 = sshll.u32 %s2225_s23, 4  ;;  %s401_s24 = int_to_ptr.vmem [resolvable:$true] %s400_s24 }
  0x11   : > { %s2226_s26 = smov 64   ;;  %s2227_s27 = smov 4  }
  0x12   : > { %p2020_p8 = pnand %p2019_p7, %p156_p1  ;;  %s139_s28 = ssub.s32 %s2223_s16, %s2353_s25 }
  0x13   : > { %s142_s29 = sadd.s32 1, %s2219_s15  ;;  %p140_p9 = scmp.eq.s32.totalorder %s139_s28, 0 }
  0x14   : > { %s398_s21 = sshll.u32 %s2692_s11, 4  ;;  %p149_p10 = scmp.ne.s32.totalorder %s2219_s15, %s2215_s30  ;;  %s399_s21 = int_to_ptr.hbm [resolvable:$true] %s398_s21 }
  0x15   : > { %2022 = dma.hbm_to_vmem [thread:$0]  (!%p2020_p8), %s399_s21, 1024, %s401_s24, [#allocation8], %s2226_s26, %s2226_s26, %s2227_s27  }
  0x16   : > { %p150_p11 = scmp.eq.s32.totalorder %s2223_s16, 0  ;;  %p2028_p12 = scmp.lt.s32.totalorder %s2223_s16, 2 }
  0x17   : > { %s2363_s19 = scalar_select %p140_p9, %s2219_s15, %s142_s29  }
  0x18   : > { %p151_p13 = por %p150_p11, %p149_p10  ;;  %s417_s20 = sand.u32 1, %s2219_s15  }
  0x19   : > { %2694 = sst [smem:[#allocation14_spill]] %s2363_s19  ;;  %s2006_s23 = smul.u32 384, %s417_s20 }
  0x1a   : > { %s2007_s11 = smul.u32 384, %s2223_s16  ;;  %p2367_p0 = pnand %p2028_p12, %p151_p13 }
  0x1b   : > { %s421_s24 = scalar_lea.vmem [#allocation4], %s2006_s23  ;;  %s418_s28 = scalar_lea.sflag [#allocation5], %s417_s20 }
  0x1c   : > { %s426_s21 = scalar_lea.hbm %s2674_s5, %s2007_s11  ;;  %s429_s26 = sshll.u32 %s421_s24, 4  ;;  %s430_s26 = int_to_ptr.vmem [resolvable:$true] %s429_s26 }
  0x1d   : > { %s427_s27 = sshll.u32 %s426_s21, 4  ;;  %p2127_p3 = pneg %p2367_p0  ;;  %s428_s27 = int_to_ptr.hbm [resolvable:$true] %s427_s27 }
  0x1e   : > { %s2123_s29 = sshra.s32 %s428_s27, 4  ;;  %s2130_s12 = scalar_lea.hbm %s2674_s5, 768  ;;  %s2124_s29 = int_to_ptr.hbm [resolvable:$true] %s2123_s29 }
  0x1f   : > { %s2125_s19 = scalar_lea.hbm %s2124_s29, 384  ;;  %p2131_p9 = scmp.lt.s32.totalorder %s2124_s29, %s2674_s5 }
  0x20   : > { %p2126_p2 = scmp.ne.s32.totalorder %s2124_s29, %s2125_s19  ;;  %p2132_p10 = scmp.lt.s32.totalorder %s2130_s12, %s2125_s19 }
  0x22   : > { %p2128_p7 = pnand %p2127_p3, %p2126_p2  ;;  %p2133_p11 = por %p2132_p10, %p2131_p9 }
  0x24   : > { %p2129_p8 = pneg %p2128_p7 }
  0x26   : > { %p2134_p12 = pnand %p2133_p11, %p2129_p8 }
  0x28   : > { %2137 = shalt.err (!%p2134_p12)
}
  0x29   : > { %s2228_s20 = smov 128   ;;  %s2229_s23 = smov 8  }
  0x2a   : > { %2026 = dma.hbm_to_vmem [thread:$0]  (!%p2367_p0), %s428_s27, 6144, %s430_s26, %s418_s28, %s2228_s20, %s2228_s20, %s2229_s23  }
  0x2b   : > { %448 = sbr.rel (%p2344_p6) target bundleno = 1473 (0x5c1), region = 72  ;;  %s450_s15 = sand.u32 (!%p2344_p6), 1, %s2215_s30  }
  0x2c   : > { %s2008_s21 = smul.u32 (!%p2344_p6), 384, %s450_s15  ;;  %s451_s24 = scalar_lea.sflag (!%p2344_p6), [#allocation5], %s450_s15 }
  0x2e   : > { %s2387_s16 = scalar_lea.vmem (!%p2344_p6), [#allocation4], %s2008_s21 }
  0x30   : > { %2198 = dma.done.wait (%p2337_p5), %s451_s24, 6144  }
  0x31   : > { %2200 = vsyncadd (%p2337_p5), %s451_s24, 4294961152 }
  0x32   : > { %2202 = dma.done.wait (%p156_p1), [#allocation8], 1024  }
  0x33   : > { %2204 = vsyncadd (%p156_p1), [#allocation8], 4294966272  ;;  %p504_p6 = scmp.lt.s32.totalorder %s2328_s17, 1 }
  0x34   : > { %512 = sbr.rel (%p1558_p4) target bundleno = 226 (0xe2), region = 84 }
  0x35   : > { %s505_s14 = scalar_select %p504_p6, %s2328_s17, 1 }
  0x37   : > { %s1563_s22 = sshll.u32 %s505_s14, 1 }
  0x38   : > { %s2402_s27 = scalar_lea.vmem %s2675_s6, %s1563_s22 }
  0x39   : > { %v1933_v0 = vld [vmem:[%s2672_s3 + $0x38] sm:$0xff]  ;;  %v1932_v1 = vld [vmem:[%s2672_s3 + $0x30] sm:$0xff]  ;;  %v1931_v2 = vld [vmem:[%s2672_s3 + $0x28] sm:$0xff]  ;;  %v2230_v15 = vmov 0.0  }
  0x3a   : > { %591 = vmatpush.bf16.msra.mxu0 %v1933_v0  ;;  %v1930_v3 = vld [vmem:[%s2672_s3 + $0x20] sm:$0xff]  ;;  %v1929_v4 = vld [vmem:[%s2672_s3 + $0x18] sm:$0xff]  ;;  %v1928_v5 = vld [vmem:[%s2672_s3 + $0x10] sm:$0xff]  ;;  %607 = vst [vmem:[#allocation3] sm:$0xff] %v2230_v15 }
  0x3b   : > { %v513_v6 = vld [vmem:[%s2669_s0] sm:$0xff]  ;;  %v514_v7 = vld [vmem:[%s2669_s0 + $0x8] sm:$0xff]  ;;  %608 = vst [vmem:[#allocation3 + $0x8] sm:$0x3] %v2230_v15 }
  0x3c   : > { %v515_v8 = vpack.c.bf16 %v513_v6, %v513_v6  ;;  %v516_v9 = vpack.c.bf16 %v514_v7, %v514_v7  ;;  %v1927_v10 = vld [vmem:[%s2672_s3 + $0x8] sm:$0xff]  ;;  %v1926_v13 = vld [vmem:[%s2672_s3] sm:$0xff]  ;;  %609 = vst [vmem:[#allocation3 + $0x10] sm:$0xff] %v2230_v15 }
  0x3d   : > { %610 = vst [vmem:[#allocation3 + $0x18] sm:$0x3] %v2230_v15  ;;  %v2073_v16 = vld [vmem:[%s2673_s4] ss:$0 sm:$0xff] }
  0x3e   : > { %592 = vmatpush.bf16.msra.mxu0 %v1932_v1  ;;  %v539_v11 = vunpack.c.l.b16 %v515_v8  ;;  %v540_v12 = vunpack.c.l.b16 %v516_v9 }
  0x40   : > { %v541_v14 = vpack.c.b16 %v540_v12, %v539_v11 }
  0x42   : > { %593 = vmatpush.bf16.msra.mxu0 %v1931_v2 }
  0x46   : > { %594 = vmatpush.bf16.msra.mxu0 %v1930_v3 }
  0x4a   : > { %595 = vmatpush.bf16.msra.mxu0 %v1929_v4 }
  0x4e   : > { %596 = vmatpush.bf16.msra.mxu0 %v1928_v5 }
  0x52   : > { %597 = vmatpush.bf16.msra.mxu0 %v1927_v10 }
  0x56   : > { %598 = vmatpush.bf16.msra.mxu0 %v1926_v13 }
  0x59   : > { %599 = vmatmul.bf16.vlgmr.msra.gmra.mxu0 %v541_v14 }
  0xd6   : > { %v600_v17 = vpop.f32.mrf.mxu0 }
  0xd7   : > { %v601_v18 = vadd.f32 %v2073_v16, %v600_v17 }
  0xd9   : > { %605 = vst [vmem:[#allocation2] sm:$0xff] %v601_v18 }
  0xde   : > { %v602_v19 = vpop.f32.mrf.mxu0 }
  0xdf   : > { %v603_v20 = vadd.f32 %v2073_v16, %v602_v19 }
  0xe1   : > { %606 = vst [vmem:[#allocation2 + $0x8] sm:$0xff] %v603_v20 }
  0xe2 PF: > { %v1964_v21 = vld [vmem:[%s2387_s16 + $0xf4] sm:$0xf]  ;;  %v1673_v22 = vld [vmem:[%s2387_s16 + $0xf8] sm:$0xf0]  ;;  %v1962_v26 = vld [vmem:[%s2387_s16 + $0xe4] sm:$0xf] }
  0xe3   : > { %v1948_v23 = vld [vmem:[%s2387_s16 + $0x74] sm:$0xf]  ;;  %v1676_v24 = vor.u32 %v1964_v21, %v1673_v22  ;;  %v1737_v25 = vld [vmem:[%s2387_s16 + $0x78] sm:$0xf0]  ;;  %v1665_v27 = vld [vmem:[%s2387_s16 + $0xe8] sm:$0xf0] }
  0xe4   : > { %v1740_v28 = vor.u32 %v1948_v23, %v1737_v25  ;;  %v1946_v29 = vld [vmem:[%s2387_s16 + $0x64] sm:$0xf]  ;;  %v1729_v30 = vld [vmem:[%s2387_s16 + $0x68] sm:$0xf0]  ;;  %v1671_v31 = vld [vmem:[%s2387_s16 + $0xf0] sm:$0xf]  ;;  %v1668_v32 = vor.u32 %v1962_v26, %v1665_v27 }
  0xe5   : > { %756 = vmatpush.bf16.msra.mxu1 %v1676_v24  ;;  %v1965_v33 = vld [vmem:[%s2387_s16 + $0xf4] sm:$0xf0]  ;;  %v1732_v34 = vor.u32 %v1946_v29, %v1729_v30  ;;  %v1960_v36 = vld [vmem:[%s2387_s16 + $0xd4] sm:$0xf]  ;;  %v1657_v37 = vld [vmem:[%s2387_s16 + $0xd8] sm:$0xf0] }
  0xe6   : > { %870 = vmatpush.bf16.msra.mxu3 %v1740_v28  ;;  %v1672_v35 = vor.u32 %v1965_v33, %v1671_v31  ;;  %v1663_v38 = vld [vmem:[%s2387_s16 + $0xe0] sm:$0xf]  ;;  %v1944_v39 = vld [vmem:[%s2387_s16 + $0x54] sm:$0xf]  ;;  %v1721_v40 = vld [vmem:[%s2387_s16 + $0x58] sm:$0xf0]  ;;  %v1660_v43 = vor.u32 %v1960_v36, %v1657_v37 }
  0xe7   : > { %v1963_v41 = vld [vmem:[%s2387_s16 + $0xe4] sm:$0xf0]  ;;  %v1655_v44 = vld [vmem:[%s2387_s16 + $0xd0] sm:$0xf]  ;;  %v1961_v45 = vld [vmem:[%s2387_s16 + $0xd4] sm:$0xf0]  ;;  %v1724_v46 = vor.u32 %v1944_v39, %v1721_v40 }
  0xe8   : > { %742 = vmatpush.bf16.msra.mxu0 %v1672_v35  ;;  %v1664_v42 = vor.u32 %v1963_v41, %v1663_v38  ;;  %v1958_v47 = vld [vmem:[%s2387_s16 + $0xc4] sm:$0xf]  ;;  %v1649_v48 = vld [vmem:[%s2387_s16 + $0xc8] sm:$0xf0]  ;;  %v1656_v51 = vor.u32 %v1961_v45, %v1655_v44  ;;  %v1647_v53 = vld [vmem:[%s2387_s16 + $0xc0] sm:$0xf] }
  0xe9   : > { %757 = vmatpush.bf16.msra.mxu1 %v1668_v32  ;;  %v1942_v49 = vld [vmem:[%s2387_s16 + $0x44] sm:$0xf]  ;;  %v1713_v50 = vld [vmem:[%s2387_s16 + $0x48] sm:$0xf0]  ;;  %v1652_v52 = vor.u32 %v1958_v47, %v1649_v48  ;;  %v1959_v54 = vld [vmem:[%s2387_s16 + $0xc4] sm:$0xf0] }
  0xea   : > { %871 = vmatpush.bf16.msra.mxu3 %v1732_v34  ;;  %v1716_v55 = vor.u32 %v1942_v49, %v1713_v50  ;;  %v1956_v56 = vld [vmem:[%s2387_s16 + $0xb4] sm:$0xf]  ;;  %v1641_v57 = vld [vmem:[%s2387_s16 + $0xb8] sm:$0xf0]  ;;  %v1735_v60 = vld [vmem:[%s2387_s16 + $0x70] sm:$0xf]  ;;  %v1648_v62 = vor.u32 %v1959_v54, %v1647_v53 }
  0xeb   : > { %v1940_v58 = vld [vmem:[%s2387_s16 + $0x34] sm:$0xf]  ;;  %v1705_v59 = vld [vmem:[%s2387_s16 + $0x38] sm:$0xf0]  ;;  %v1949_v61 = vld [vmem:[%s2387_s16 + $0x74] sm:$0xf0]  ;;  %v1644_v1 = vor.u32 %v1956_v56, %v1641_v57 }
  0xec   : > { %743 = vmatpush.bf16.msra.mxu0 %v1664_v42  ;;  %v1954_v63 = vld [vmem:[%s2387_s16 + $0xa4] sm:$0xf]  ;;  %v1736_v0 = vor.u32 %v1949_v61, %v1735_v60  ;;  %v1633_v2 = vld [vmem:[%s2387_s16 + $0xa8] sm:$0xf0]  ;;  %v1639_v3 = vld [vmem:[%s2387_s16 + $0xb0] sm:$0xf]  ;;  %v1708_v5 = vor.u32 %v1940_v58, %v1705_v59 }
  0xed   : > { %758 = vmatpush.bf16.msra.mxu1 %v1660_v43  ;;  %v1957_v4 = vld [vmem:[%s2387_s16 + $0xb4] sm:$0xf0]  ;;  %v1938_v6 = vld [vmem:[%s2387_s16 + $0x24] sm:$0xf]  ;;  %v1697_v7 = vld [vmem:[%s2387_s16 + $0x28] sm:$0xf0]  ;;  %v1636_v15 = vor.u32 %v1954_v63, %v1633_v2 }
  0xee   : > { %872 = vmatpush.bf16.msra.mxu3 %v1724_v46  ;;  %856 = vmatpush.bf16.msra.mxu2 %v1736_v0  ;;  %v1727_v8 = vld [vmem:[%s2387_s16 + $0x60] sm:$0xf]  ;;  %v1947_v9 = vld [vmem:[%s2387_s16 + $0x64] sm:$0xf0]  ;;  %v2477_v10 = vld [vmem:[#allocation2] sm:$0xff]  ;;  %v1640_v12 = vor.u32 %v1957_v4, %v1639_v3  ;;  %v1700_v18 = vor.u32 %v1938_v6, %v1697_v7  ;;  %vm1201_vm8 = vcmask 64512  }
  0xef   : > { %v2479_v11 = vld [vmem:[#allocation2 + $0x8] sm:$0xff]  ;;  %v1952_v13 = vld [vmem:[%s2387_s16 + $0x94] sm:$0xf]  ;;  %v1728_v14 = vor.u32 %v1947_v9, %v1727_v8  ;;  %613 = vst [vmem:[#allocation3 + $0x2] sm:$0xff] %v2477_v10  ;;  %v1631_v16 = vld [vmem:[%s2387_s16 + $0xa0] sm:$0xf] }
  0xf0   : > { %744 = vmatpush.bf16.msra.mxu0 %v1656_v51  ;;  %v1955_v17 = vld [vmem:[%s2387_s16 + $0xa4] sm:$0xf0]  ;;  %614 = vst [vmem:[#allocation3 + $0x12] sm:$0xff] %v2479_v11  ;;  %v1625_v19 = vld [vmem:[%s2387_s16 + $0x98] sm:$0xf0]  ;;  %vm1233_vm9 = vcmask 1043456  }
  0xf1   : > { %759 = vmatpush.bf16.msra.mxu1 %v1652_v52  ;;  %v1719_v20 = vld [vmem:[%s2387_s16 + $0x50] sm:$0xf]  ;;  %v1945_v21 = vld [vmem:[%s2387_s16 + $0x54] sm:$0xf0]  ;;  %v1936_v22 = vld [vmem:[%s2387_s16 + $0x14] sm:$0xf]  ;;  %v1632_v25 = vor.u32 %v1955_v17, %v1631_v16  ;;  %v1628_v30 = vor.u32 %v1952_v13, %v1625_v19 }
  0xf2   : > { %873 = vmatpush.bf16.msra.mxu3 %v1716_v55  ;;  %857 = vmatpush.bf16.msra.mxu2 %v1728_v14  ;;  %v1689_v23 = vld [vmem:[%s2387_s16 + $0x18] sm:$0xf0]  ;;  %v1720_v24 = vor.u32 %v1945_v21, %v1719_v20  ;;  %v1950_v26 = vld [vmem:[%s2387_s16 + $0x84] sm:$0xf]  ;;  %v1617_v27 = vld [vmem:[%s2387_s16 + $0x88] sm:$0xf0] }
  0xf3   : > { %v1711_v28 = vld [vmem:[%s2387_s16 + $0x40] sm:$0xf]  ;;  %v1943_v29 = vld [vmem:[%s2387_s16 + $0x44] sm:$0xf0]  ;;  %v1934_v31 = vld [vmem:[%s2387_s16 + $0x4] sm:$0xf]  ;;  %v1692_v34 = vor.u32 %v1936_v22, %v1689_v23  ;;  %v1620_v48 = vor.u32 %v1950_v26, %v1617_v27 }
  0xf4   : > { %745 = vmatpush.bf16.msra.mxu0 %v1648_v62  ;;  %v1623_v32 = vld [vmem:[%s2387_s16 + $0x90] sm:$0xf]  ;;  %v1953_v33 = vld [vmem:[%s2387_s16 + $0x94] sm:$0xf0]  ;;  %v1681_v35 = vld [vmem:[%s2387_s16 + $0x8] sm:$0xf0]  ;;  %v1712_v38 = vor.u32 %v1943_v29, %v1711_v28 }
  0xf5   : > { %760 = vmatpush.bf16.msra.mxu1 %v1644_v1  ;;  %v1980_v36 = vld [vmem:[%s2387_s16 + $0x174] sm:$0xf]  ;;  %v1817_v37 = vld [vmem:[%s2387_s16 + $0x178] sm:$0xf0]  ;;  %v1703_v41 = vld [vmem:[%s2387_s16 + $0x30] sm:$0xf]  ;;  %v1624_v42 = vor.u32 %v1953_v33, %v1623_v32  ;;  %v1684_v53 = vor.u32 %v1934_v31, %v1681_v35 }
  0xf6   : > { %874 = vmatpush.bf16.msra.mxu3 %v1708_v5  ;;  %858 = vmatpush.bf16.msra.mxu2 %v1720_v24  ;;  %v615_v39 = vld [vmem:[#allocation3] sm:$0xff]  ;;  %v1941_v47 = vld [vmem:[%s2387_s16 + $0x34] sm:$0xf0]  ;;  %v1951_v51 = vld [vmem:[%s2387_s16 + $0x84] sm:$0xf0]  ;;  %v1820_v54 = vor.u32 %v1980_v36, %v1817_v37  ;;  %p1889_p1 = scmp.ne.s32.totalorder %s2328_s17, 1 }
  0xf7   : > { %v635_v40 = vld [vmem:[#allocation3 + $0x1] sm:$0xff]  ;;  %v616_v43 = vld [vmem:[#allocation3 + $0x10] sm:$0xff]  ;;  %v617_v44 = vpack.c.bf16 %v615_v39, %v615_v39  ;;  %v1981_v57 = vld [vmem:[%s2387_s16 + $0x174] sm:$0xf0]  ;;  %v1704_v63 = vor.u32 %v1941_v47, %v1703_v41  ;;  %s2696_s20 = sld [smem:[#allocation16_spill]] (!%p1889_p1) }
  0xf8   : > { %746 = vmatpush.bf16.msra.mxu0 %v1640_v12  ;;  %v636_v45 = vld [vmem:[#allocation3 + $0x11] sm:$0xff]  ;;  %v637_v46 = vpack.c.bf16 %v635_v40, %v635_v40  ;;  %v618_v49 = vpack.c.bf16 %v616_v43, %v616_v43  ;;  %v1615_v50 = vld [vmem:[%s2387_s16 + $0x80] sm:$0xf]  ;;  %v1978_v60 = vld [vmem:[%s2387_s16 + $0x164] sm:$0xf]  ;;  %s2697_s21 = sld [smem:[#allocation17_spill]] (!%p1889_p1) }
  0xf9   : > { %761 = vmatpush.bf16.msra.mxu1 %v1636_v15  ;;  %v638_v52 = vpack.c.bf16 %v636_v45, %v636_v45  ;;  %v772_v55 = vunpack.c.l.b16 %v617_v44  ;;  %v1815_v56 = vld [vmem:[%s2387_s16 + $0x170] sm:$0xf]  ;;  %v1809_v61 = vld [vmem:[%s2387_s16 + $0x168] sm:$0xf0]  ;;  %v1616_v0 = vor.u32 %v1951_v51, %v1615_v50  ;;  %v1695_v1 = vld [vmem:[%s2387_s16 + $0x20] sm:$0xf]  ;;  %v886_v45 = vpack.c.bf16 %v2477_v10, %v2477_v10 }
  0xfa   : > { %875 = vmatpush.bf16.msra.mxu3 %v1700_v18  ;;  %v658_v58 = vunpack.c.l.b16 %v637_v46  ;;  %859 = vmatpush.bf16.msra.mxu2 %v1712_v38  ;;  %v773_v59 = vunpack.c.l.b16 %v618_v49  ;;  %v1939_v2 = vld [vmem:[%s2387_s16 + $0x24] sm:$0xf0]  ;;  %v1816_v4 = vor.u32 %v1981_v57, %v1815_v56  ;;  %v1812_v6 = vor.u32 %v1978_v60, %v1809_v61  ;;  %v1807_v7 = vld [vmem:[%s2387_s16 + $0x160] sm:$0xf]  ;;  %v1976_v9 = vld [vmem:[%s2387_s16 + $0x154] sm:$0xf] }
  0xfb   : > { %v659_v62 = vunpack.c.l.b16 %v638_v52  ;;  %v1979_v8 = vld [vmem:[%s2387_s16 + $0x164] sm:$0xf0]  ;;  %v1801_v12 = vld [vmem:[%s2387_s16 + $0x158] sm:$0xf0]  ;;  %v1696_v13 = vor.u32 %v1939_v2, %v1695_v1  ;;  %v1687_v14 = vld [vmem:[%s2387_s16 + $0x10] sm:$0xf]  ;;  %v887_v46 = vpack.c.bf16 %v2479_v11, %v2479_v11 }
  0xfc   : > { %747 = vmatpush.bf16.msra.mxu0 %v1632_v25  ;;  %v774_v3 = vpack.c.b16 %v773_v59, %v772_v55  ;;  %v1937_v15 = vld [vmem:[%s2387_s16 + $0x14] sm:$0xf0]  ;;  %v1808_v16 = vor.u32 %v1979_v8, %v1807_v7  ;;  %v1804_v17 = vor.u32 %v1976_v9, %v1801_v12  ;;  %v1799_v18 = vld [vmem:[%s2387_s16 + $0x150] sm:$0xf]  ;;  %v1974_v20 = vld [vmem:[%s2387_s16 + $0x144] sm:$0xf] }
  0xfd   : > { %762 = vmatpush.bf16.msra.mxu1 %v1628_v30  ;;  %v660_v5 = vpack.c.b16 %v659_v62, %v658_v58  ;;  %v1977_v19 = vld [vmem:[%s2387_s16 + $0x154] sm:$0xf0]  ;;  %v1793_v21 = vld [vmem:[%s2387_s16 + $0x148] sm:$0xf0]  ;;  %v1688_v22 = vor.u32 %v1937_v15, %v1687_v14  ;;  %v1679_v23 = vld [vmem:[%s2387_s16] sm:$0xf] }
  0xfe   : > { %876 = vmatpush.bf16.msra.mxu3 %v1692_v34  ;;  %860 = vmatpush.bf16.msra.mxu2 %v1704_v63  ;;  %v1935_v24 = vld [vmem:[%s2387_s16 + $0x4] sm:$0xf0]  ;;  %v1800_v25 = vor.u32 %v1977_v19, %v1799_v18  ;;  %v1796_v26 = vor.u32 %v1974_v20, %v1793_v21  ;;  %v1791_v27 = vld [vmem:[%s2387_s16 + $0x140] sm:$0xf]  ;;  %v1972_v29 = vld [vmem:[%s2387_s16 + $0x134] sm:$0xf] }
  0xff   : > { %v1975_v28 = vld [vmem:[%s2387_s16 + $0x144] sm:$0xf0]  ;;  %v1785_v30 = vld [vmem:[%s2387_s16 + $0x138] sm:$0xf0]  ;;  %v1680_v31 = vor.u32 %v1935_v24, %v1679_v23  ;;  %v1783_v34 = vld [vmem:[%s2387_s16 + $0x130] sm:$0xf] }
 0x100   : > { %748 = vmatpush.bf16.msra.mxu0 %v1624_v42  ;;  %v1792_v32 = vor.u32 %v1975_v28, %v1791_v27  ;;  %v1788_v33 = vor.u32 %v1972_v29, %v1785_v30  ;;  %v1973_v35 = vld [vmem:[%s2387_s16 + $0x134] sm:$0xf0]  ;;  %v1970_v36 = vld [vmem:[%s2387_s16 + $0x124] sm:$0xf]  ;;  %v1777_v37 = vld [vmem:[%s2387_s16 + $0x128] sm:$0xf0] }
 0x101   : > { %763 = vmatpush.bf16.msra.mxu1 %v1620_v48  ;;  %v1784_v38 = vor.u32 %v1973_v35, %v1783_v34  ;;  %v1780_v39 = vor.u32 %v1970_v36, %v1777_v37  ;;  %v1775_v40 = vld [vmem:[%s2387_s16 + $0x120] sm:$0xf]  ;;  %v1971_v41 = vld [vmem:[%s2387_s16 + $0x124] sm:$0xf0]  ;;  %v1968_v42 = vld [vmem:[%s2387_s16 + $0x114] sm:$0xf] }
 0x102   : > { %877 = vmatpush.bf16.msra.mxu3 %v1684_v53  ;;  %861 = vmatpush.bf16.msra.mxu2 %v1696_v13  ;;  %v1769_v43 = vld [vmem:[%s2387_s16 + $0x118] sm:$0xf0]  ;;  %v1776_v44 = vor.u32 %v1971_v41, %v1775_v40  ;;  %v1767_v48 = vld [vmem:[%s2387_s16 + $0x110] sm:$0xf]  ;;  %v1969_v49 = vld [vmem:[%s2387_s16 + $0x114] sm:$0xf0]  ;;  %v907_v53 = vunpack.c.l.b16 %v886_v45 }
 0x103   : > { %v1772_v47 = vor.u32 %v1968_v42, %v1769_v43  ;;  %v1966_v50 = vld [vmem:[%s2387_s16 + $0x104] sm:$0xf]  ;;  %v1761_v51 = vld [vmem:[%s2387_s16 + $0x108] sm:$0xf0]  ;;  %v1768_v52 = vor.u32 %v1969_v49, %v1767_v48  ;;  %v1759_v56 = vld [vmem:[%s2387_s16 + $0x100] sm:$0xf] }
 0x104   : > { %749 = vmatpush.bf16.msra.mxu0 %v1616_v0  ;;  %764 = vmatmul.bf16.vlgmr.msra.gmra.mxu1 %v660_v5  ;;  %v1764_v55 = vor.u32 %v1966_v50, %v1761_v51  ;;  %v1967_v57 = vld [vmem:[%s2387_s16 + $0x104] sm:$0xf0]  ;;  %v1988_v62 = vld [vmem:[%s2676_s7 + $0x30] sm:$0xff]  ;;  %v1987_v0 = vld [vmem:[%s2676_s7 + $0x28] sm:$0xff] }
 0x105   : > { %1005 = vmatpush.bf16.msrb.mxu1 %v1820_v54  ;;  %878 = vmatmul.bf16.vlgmr.msra.gmra.mxu3 %v774_v3  ;;  %v908_v54 = vunpack.c.l.b16 %v887_v46  ;;  %v1760_v59 = vor.u32 %v1967_v57, %v1759_v56  ;;  %v1989_v61 = vld [vmem:[%s2676_s7 + $0x38] sm:$0xff]  ;;  %v2555_v2 = vld [vmem:[%s2402_s27] sm:$0x3]  ;;  %v1984_v15 = vld [vmem:[%s2676_s7 + $0x10] sm:$0xff] }
 0x106   : > { %862 = vmatpush.bf16.msra.mxu2 %v1688_v22  ;;  %v1985_v8 = vld [vmem:[%s2676_s7 + $0x18] sm:$0xff]  ;;  %v1983_v19 = vld [vmem:[%s2676_s7 + $0x8] sm:$0xff]  ;;  %v1982_v21 = vld [vmem:[%s2676_s7] sm:$0xff]  ;;  %v1025_v43 = vperm.slane %v2555_v2, 0 }
 0x107   : > { %750 = vmatmul.bf16.vlgmr.msra.gmra.mxu0 %v660_v5  ;;  %v909_v58 = vpack.c.b16 %v908_v54, %v907_v53  ;;  %v1026_v5 = vperm.slane %v2555_v2, 1 }
 0x108   : > { %991 = vmatpush.bf16.msrb.mxu0 %v1816_v4 }
 0x109   : > { %1006 = vmatpush.bf16.msrb.mxu1 %v1812_v6 }
 0x10a   : > { %863 = vmatpush.bf16.msra.mxu2 %v1680_v31 }
 0x10c   : > { %992 = vmatpush.bf16.msrb.mxu0 %v1808_v16 }
 0x10d   : > { %1007 = vmatpush.bf16.msrb.mxu1 %v1804_v17  ;;  %864 = vmatmul.bf16.vlgmr.msra.gmra.mxu2 %v774_v3  ;;  %v1986_v3 = vld [vmem:[%s2676_s7 + $0x20] sm:$0xff] }
 0x10e   : > { %1149 = vmatpush.bf16.msrb.mxu2 %v1989_v61 }
 0x110   : > { %993 = vmatpush.bf16.msrb.mxu0 %v1800_v25 }
 0x111   : > { %1008 = vmatpush.bf16.msrb.mxu1 %v1796_v26  ;;  %v1171_v26 = vld [vmem:[%s2670_s1] sm:$0xff] }
 0x112   : > { %1150 = vmatpush.bf16.msrb.mxu2 %v1988_v62  ;;  %v1173_v28 = vpack.c.bf16 %v1171_v26, %v1171_v26 }
 0x114   : > { %994 = vmatpush.bf16.msrb.mxu0 %v1792_v32  ;;  %1182 = vmatpush.bf16.xpose.msrb.mxu3 %v1173_v28 }
 0x115   : > { %1009 = vmatpush.bf16.msrb.mxu1 %v1788_v33 }
 0x116   : > { %1151 = vmatpush.bf16.msrb.mxu2 %v1987_v0 }
 0x118   : > { %995 = vmatpush.bf16.msrb.mxu0 %v1784_v38 }
 0x119   : > { %1010 = vmatpush.bf16.msrb.mxu1 %v1780_v39 }
 0x11a   : > { %1152 = vmatpush.bf16.msrb.mxu2 %v1986_v3 }
 0x11c   : > { %996 = vmatpush.bf16.msrb.mxu0 %v1776_v44 }
 0x11d   : > { %1011 = vmatpush.bf16.msrb.mxu1 %v1772_v47 }
 0x11e   : > { %1153 = vmatpush.bf16.msrb.mxu2 %v1985_v8  ;;  %v1163_v8 = vld [vmem:[%s2669_s0] sm:$0xff] }
 0x120   : > { %997 = vmatpush.bf16.msrb.mxu0 %v1768_v52 }
 0x121   : > { %1012 = vmatpush.bf16.msrb.mxu1 %v1764_v55 }
 0x122   : > { %1154 = vmatpush.bf16.msrb.mxu2 %v1984_v15 }
 0x124   : > { %1013 = vmatmul.bf16.vlgmr.msrb.gmra.mxu1 %v909_v58  ;;  %998 = vmatpush.bf16.msrb.mxu0 %v1760_v59 }
 0x126   : > { %1155 = vmatpush.bf16.msrb.mxu2 %v1983_v19 }
 0x127   : > { %999 = vmatmul.bf16.vlgmr.msrb.gmra.mxu0 %v909_v58 }
 0x12a   : > { %1156 = vmatpush.bf16.msrb.mxu2 %v1982_v21 }
 0x181   : > { %v765_v60 = vpop.f32.mrf.mxu1 }
 0x184   : > { %v751_v9 = vpop.f32.mrf.mxu0 }
 0x188   : > { %v879_v1 = vpop.f32.mrf.mxu3 }
 0x189   : > { %v767_v63 = vpop.f32.mrf.mxu1  ;;  %v880_v4 = vadd.f32 %v879_v1, %v765_v60 }
 0x18c   : > { %v753_v22 = vpop.f32.mrf.mxu0 }
 0x190   : > { %v881_v13 = vpop.f32.mrf.mxu3  ;;  %v865_v27 = vpop.f32.mrf.mxu2 }
 0x191   : > { %v882_v16 = vadd.f32 %v881_v13, %v767_v63  ;;  %v866_v35 = vadd.f32 %v865_v27, %v751_v9 }
 0x198   : > { %v867_v38 = vpop.f32.mrf.mxu2 }
 0x199   : > { %v868_v45 = vadd.f32 %v867_v38, %v753_v22 }
 0x1a1   : > { %v1014_v6 = vpop.f32.mrf.mxu1 }
 0x1a2   : > { %v1020_v7 = vadd.f32 %v1014_v6, %v880_v4  ;;  %v1172_v4 = vld [vmem:[%s2670_s1 + $0x8] sm:$0xff]  ;;  %v2074_v6 = vld [vmem:[%s2677_s8] ss:$0 sm:$0xff] }
 0x1a4   : > { %v1030_v12 = vadd.f32 %v1026_v5, %v1020_v7  ;;  %v1000_v31 = vpop.f32.mrf.mxu0 }
 0x1a5   : > { %v1019_v42 = vadd.f32 %v1000_v31, %v866_v35 }
 0x1a6   : > { %v1821_v14 = vmul.f32 -1.442695, %v1030_v12 }
 0x1a7   : > { %v1029_v50 = vadd.f32 %v1025_v43, %v1019_v42 }
 0x1a8   : > { %2076 = vpow2.f32 %v1821_v14 }
 0x1a9   : > { %v1016_v17 = vpop.f32.mrf.mxu1 }
 0x1aa   : > { %v1022_v18 = vadd.f32 %v1016_v17, %v882_v16  ;;  %v1164_v17 = vld [vmem:[%s2669_s0 + $0x8] sm:$0xff] }
 0x1ac   : > { %v1032_v20 = vadd.f32 %v1026_v5, %v1022_v18  ;;  %v1002_v48 = vpop.f32.mrf.mxu0  ;;  %v1174_v5 = vpack.c.bf16 %v1172_v4, %v1172_v4 }
 0x1ad   : > { %v1021_v53 = vadd.f32 %v1002_v48, %v868_v45 }
 0x1ae   : > { %v2077_v23 = vpop.eup %2076  ;;  %v1822_v24 = vmul.f32 -1.442695, %v1032_v20  ;;  %1195 = vmatpush.bf16.xpose.msra.mxu3 %v1174_v5 }
 0x1af   : > { %v1039_v25 = vadd.f32 1.0, %v2077_v23  ;;  %v1031_v59 = vadd.f32 %v1025_v43, %v1021_v53  ;;  %v1997_v43 = vld [vmem:[%s2678_s9 + $0x38] sm:$0xff]  ;;  %v1995_v53 = vld [vmem:[%s2678_s9 + $0x28] sm:$0xff] }
 0x1b0   : > { %2078 = vpow2.f32 %v1822_v24  ;;  %1345 = vmatpush.bf16.msra.mxu2 %v1997_v43 }
 0x1b1   : > { %2080 = vrcp.f32 %v1039_v25  ;;  %v1052_v37 = vand.u32 2147483648, %v1039_v25  ;;  %vm1046_vm1 = vweird.f32 %v1039_v25  ;;  %v1050_v40 = vand.u32 2147483647, %v1039_v25 }
 0x1b3   : > { %v1053_v47 = vor.u32 1.1754944e-38, %v1052_v37  ;;  %vm1051_vm3 = vcmp.eq.f32.partialorder %v1050_v40, 8.507059e+37  ;;  %v1226_v37 = vld [vmem:[%s2671_s2] sm:$0xff]  ;;  %v1227_v40 = vld [vmem:[%s2671_s2 + $0x8] sm:$0xff] }
 0x1b4   : > { %v1228_v38 = vpack.c.bf16 %v1226_v37, %v1226_v37 }
 0x1b6   : > { %v2079_v29 = vpop.eup %2078 }
 0x1b7   : > { %v2081_v30 = vpop.eup %2080  ;;  %v1040_v32 = vadd.f32 1.0, %v2079_v29 }
 0x1b8   : > { %v1042_v33 = vmul.f32 %v2081_v30, %v1039_v25  ;;  %vm1047_vm0 = vweird.f32 %v2081_v30 }
 0x1b9   : > { %2082 = vrcp.f32 %v1040_v32  ;;  %vm1048_vm2 = vmor %vm1046_vm1, %vm1047_vm0  ;;  %v1067_v52 = vand.u32 2147483648, %v1040_v32  ;;  %v1065_v55 = vand.u32 2147483647, %v1040_v32  ;;  %vm1061_vm5 = vweird.f32 %v1040_v32 }
 0x1ba   : > { %v1043_v34 = vsub.f32 1.0, %v1042_v33 }
 0x1bb   : > { %v1068_v58 = vor.u32 1.1754944e-38, %v1067_v52  ;;  %vm1066_vm7 = vcmp.eq.f32.partialorder %v1065_v55, 8.507059e+37  ;;  %v1993_v55 = vld [vmem:[%s2678_s9 + $0x18] sm:$0xff] }
 0x1bc   : > { %v1044_v36 = vmul.f32 %v2081_v30, %v1043_v34 }
 0x1be   : > { %v1045_v39 = vadd.f32 %v2081_v30, %v1044_v36 }
 0x1bf   : > { %v2083_v41 = vpop.eup %2082 }
 0x1c0   : > { %v1049_v44 = vsel %vm1048_vm2, %v2081_v30, %v1045_v39  ;;  %v1057_v46 = vmul.f32 %v2083_v41, %v1040_v32  ;;  %vm1062_vm4 = vweird.f32 %v2083_v41  ;;  %v1235_v39 = vsel %vm1233_vm9, %v1228_v38, 0 }
 0x1c1   : > { %v1054_v51 = vsel %vm1051_vm3, %v1053_v47, %v1049_v44  ;;  %vm1063_vm6 = vmor %vm1061_vm5, %vm1062_vm4  ;;  %1244 = vmatpush.bf16.msra.mxu0 %v1235_v39  ;;  %v1996_v44 = vld [vmem:[%s2678_s9 + $0x30] sm:$0xff] }
 0x1c2   : > { %v1058_v49 = vsub.f32 1.0, %v1057_v46  ;;  %v2577_v56 = vmul.f32 %v1054_v51, %v1029_v50  ;;  %1346 = vmatpush.bf16.msra.mxu2 %v1996_v44 }
 0x1c4   : > { %v1059_v54 = vmul.f32 %v2083_v41, %v1058_v49  ;;  %v1073_v63 = vpack.c.bf16 %v2577_v56, %v2577_v56 }
 0x1c6   : > { %v1060_v57 = vadd.f32 %v2083_v41, %v1059_v54  ;;  %v1097_v1 = vunpack.c.l.b16 %v1073_v63  ;;  %1347 = vmatpush.bf16.msra.mxu2 %v1995_v53  ;;  %v1994_v54 = vld [vmem:[%s2678_s9 + $0x20] sm:$0xff] }
 0x1c8   : > { %v1064_v60 = vsel %vm1063_vm6, %v2083_v41, %v1060_v57  ;;  %v1229_v41 = vpack.c.bf16 %v1227_v40, %v1227_v40  ;;  %v1992_v57 = vld [vmem:[%s2678_s9 + $0x10] sm:$0xff] }
 0x1c9   : > { %v1069_v61 = vsel %vm1066_vm7, %v1068_v58, %v1064_v60  ;;  %v1991_v58 = vld [vmem:[%s2678_s9 + $0x8] sm:$0xff] }
 0x1ca   : > { %v2579_v62 = vmul.f32 %v1069_v61, %v1031_v59  ;;  %v1254_v42 = vsel %vm1233_vm9, %v1229_v41, 0  ;;  %1348 = vmatpush.bf16.msra.mxu2 %v1994_v54  ;;  %v1990_v59 = vld [vmem:[%s2678_s9] sm:$0xff] }
 0x1cb   : > { %1263 = vmatpush.bf16.msra.mxu1 %v1254_v42 }
 0x1cc   : > { %v1074_v0 = vpack.c.bf16 %v2579_v62, %v2579_v62 }
 0x1ce   : > { %v1098_v2 = vunpack.c.l.b16 %v1074_v0  ;;  %1349 = vmatpush.bf16.msra.mxu2 %v1993_v55 }
 0x1d0   : > { %v1099_v3 = vpack.c.b16 %v1098_v2, %v1097_v1 }
 0x1d2   : > { %1157 = vmatmul.bf16.vlgmr.msrb.gmra.mxu2 %v1099_v3 }
 0x1d3   : > { %1350 = vmatpush.bf16.msra.mxu2 %v1992_v57 }
 0x1d7   : > { %1351 = vmatpush.bf16.msra.mxu2 %v1991_v58 }
 0x1db   : > { %1352 = vmatpush.bf16.msra.mxu2 %v1990_v59 }
 0x255   : > { %v1158_v7 = vpop.f32.mrf.mxu2 }
 0x256   : > { %v1159_v9 = vadd.f32 %v2074_v6, %v1158_v7 }
 0x258   : > { %v1165_v12 = vadd.f32 %v1163_v8, %v1159_v9 }
 0x25a   : > { %v1167_v13 = vmul.f32 0.70710677, %v1165_v12 }
 0x25c   : > { %v1169_v14 = vpack.c.bf16 %v1167_v13, %v1167_v13 }
 0x25d   : > { %v1160_v15 = vpop.f32.mrf.mxu2 }
 0x25e   : > { %1183 = vmatmul.bf16.vlgmr.msrb.gmra.mxu3 %v1169_v14  ;;  %v1161_v16 = vadd.f32 %v2074_v6, %v1160_v15  ;;  %v2075_v6 = vld [vmem:[%s2679_s10] ss:$0 sm:$0xff] }
 0x260   : > { %v1166_v18 = vadd.f32 %v1164_v17, %v1161_v16 }
 0x262   : > { %v1168_v19 = vmul.f32 0.70710677, %v1166_v18 }
 0x264   : > { %v1170_v20 = vpack.c.bf16 %v1168_v19, %v1168_v19 }
 0x26e   : > { %1196 = vmatmul.bf16.vlgmr.msra.gmra.mxu3 %v1170_v20 }
 0x2e1   : > { %v1184_v21 = vpop.f32.mrf.mxu3 }
 0x2e2   : > { %v1202_v22 = vsel %vm1201_vm8, %v1184_v21, -inf }
 0x2e3   : > { %1203 = vmax.xlane.f32.xlu0 %v1202_v22 }
 0x2e9   : > { %v1186_v23 = vpop.f32.mrf.mxu3 }
 0x2f1   : > { %v1197_v24 = vpop.f32.mrf.mxu3 }
 0x2f2   : > { %v1205_v25 = vsel %vm1201_vm8, %v1197_v24, -inf }
 0x2f3   : > { %1206 = vmax.xlane.f32.xlu0 %v1205_v25 }
 0x2f9   : > { %v1199_v26 = vpop.f32.mrf.mxu3 }
 0x356   : > { %v1204_v27 = vpop.xlane.xlu0 %1203 }
 0x357   : > { %v1208_v28 = vsub.f32 %v1184_v21, %v1204_v27 }
 0x359   : > { %v1210_v29 = vmul.f32 1.442695, %v1208_v28 }
 0x35b   : > { %2084 = vpow2.f32 %v1210_v29 }
 0x361   : > { %v2085_v30 = vpop.eup %2084 }
 0x362   : > { %v1214_v31 = vsel %vm1201_vm8, %v2085_v30, 0.0 }
 0x363   : > { %1215 = vadd.xlane.f32.xlu1 %v1214_v31 }
 0x366   : > { %v1207_v32 = vpop.xlane.xlu0 %1206 }
 0x367   : > { %v1209_v33 = vsub.f32 %v1197_v24, %v1207_v32 }
 0x369   : > { %v1212_v34 = vmul.f32 1.442695, %v1209_v33 }
 0x36b   : > { %2086 = vpow2.f32 %v1212_v34 }
 0x371   : > { %v2087_v35 = vpop.eup %2086 }
 0x372   : > { %v1217_v36 = vsel %vm1201_vm8, %v2087_v35, 0.0 }
 0x373   : > { %1218 = vadd.xlane.f32.xlu1 %v1217_v36 }
 0x3d6   : > { %v1216_v45 = vpop.xlane.xlu1 %1215 }
 0x3d7   : > { %2088 = vrcp.f32 %v1216_v45 }
 0x3dd   : > { %v2089_v46 = vpop.eup %2088 }
 0x3de   : > { %v1222_v47 = vmul.f32 %v2089_v46, %v2085_v30 }
 0x3e0   : > { %v1224_v48 = vpack.c.bf16 %v1222_v47, %v1222_v47  ;;  %1369 = vst.msk [vmem:[#allocation9] sm:$0xff] %vm1201_vm8, %v1222_v47 }
 0x3e2   : > { %1855 = vmatmul.msk.bf16.vlgmr.msra.gmra.mxu0 %vm1201_vm8, %v1224_v48 }
 0x3e6   : > { %v1219_v49 = vpop.xlane.xlu1 %1218 }
 0x3e7   : > { %2090 = vrcp.f32 %v1219_v49 }
 0x3ed   : > { %v2091_v50 = vpop.eup %2090 }
 0x3ee   : > { %v1223_v51 = vmul.f32 %v2091_v50, %v2087_v35 }
 0x3f0   : > { %v1225_v52 = vpack.c.bf16 %v1223_v51, %v1223_v51  ;;  %1370 = vst.msk [vmem:[#allocation9 + $0x8] sm:$0xff] %vm1201_vm8, %v1223_v51 }
 0x3f2   : > { %1856 = vmatmul.msk.bf16.vlgmr.msra.gmra.mxu1 %vm1201_vm8, %v1225_v52 }
 0x45f   : > { %v1246_v60 = vpop.f32.mrf.mxu0 }
 0x460   : > { %v1269_v63 = vpack.c.bf16 %v1246_v60, %v1246_v60 }
 0x462   : > { %v1293_v2 = vunpack.c.l.b16 %v1269_v63 }
 0x467   : > { %v1248_v61 = vpop.f32.mrf.mxu0 }
 0x46f   : > { %v1265_v0 = vpop.f32.mrf.mxu1 }
 0x470   : > { %v1270_v1 = vpack.c.bf16 %v1265_v0, %v1265_v0 }
 0x472   : > { %v1294_v3 = vunpack.c.l.b16 %v1270_v1 }
 0x474   : > { %v1295_v4 = vpack.c.b16 %v1294_v3, %v1293_v2 }
 0x476   : > { %1353 = vmatmul.bf16.vlgmr.msra.gmra.mxu2 %v1295_v4 }
 0x477   : > { %v1267_v5 = vpop.f32.mrf.mxu1 }
 0x4f9   : > { %v1354_v7 = vpop.f32.mrf.mxu2 }
 0x4fa   : > { %v1355_v8 = vadd.f32 %v2075_v6, %v1354_v7 }
 0x4fc   : > { %v1359_v9 = vadd.f32 %v1355_v8, %v2577_v56 }
 0x4fe   : > { %v1361_v12 = vmul.f32 0.70710677, %v1359_v9 }
 0x500   : > { %v1363_v13 = vadd.f32 %v1361_v12, %v2477_v10 }
 0x501   : > { %v1356_v14 = vpop.f32.mrf.mxu2 }
 0x502   : > { %v1365_v15 = vmul.f32 0.70710677, %v1363_v13  ;;  %v1357_v16 = vadd.f32 %v2075_v6, %v1356_v14 }
 0x504   : > { %1367 = vst [vmem:[#allocation2] sm:$0xff] %v1365_v15  ;;  %v1360_v17 = vadd.f32 %v1357_v16, %v2579_v62 }
 0x506   : > { %v1362_v18 = vmul.f32 0.70710677, %v1360_v17 }
 0x508   : > { %v1364_v19 = vadd.f32 %v1362_v18, %v2479_v11  ;;  %1374 = sbr.rel (%p1889_p1) target bundleno = 1462 (0x5b6), region = 88 }
 0x50a   : > { %v1366_v20 = vmul.f32 0.70710677, %v1364_v19 }
 0x50c   : > { %1368 = vst [vmem:[#allocation2 + $0x8] sm:$0xff] %v1366_v20 }
 0x50d   : > { %v2005_v21 = vld [vmem:[#allocation7 + $0x38] sm:$0xff]  ;;  %v2004_v56 = vld [vmem:[#allocation7 + $0x30] sm:$0xff]  ;;  %v2003_v22 = vld [vmem:[#allocation7 + $0x28] sm:$0xff]  ;;  %v1375_v62 = vpack.c.bf16 %v1365_v15, %v1365_v15  ;;  %v1376_v25 = vpack.c.bf16 %v1366_v20, %v1366_v20 }
 0x50e   : > { %1451 = vmatpush.bf16.msra.mxu0 %v2005_v21  ;;  %v2002_v10 = vld [vmem:[#allocation7 + $0x20] sm:$0xff]  ;;  %v2001_v23 = vld [vmem:[#allocation7 + $0x18] sm:$0xff]  ;;  %v2000_v24 = vld [vmem:[#allocation7 + $0x10] sm:$0xff] }
 0x50f   : > { %v1999_v11 = vld [vmem:[#allocation7 + $0x8] sm:$0xff]  ;;  %v1399_v26 = vunpack.c.l.b16 %v1375_v62  ;;  %v1400_v27 = vunpack.c.l.b16 %v1376_v25  ;;  %v1998_v28 = vld [vmem:[#allocation7] sm:$0xff]  ;;  %v2092_v30 = vld [vmem:[%s2696_s20] ss:$0 sm:$0xff] }
 0x511   : > { %v1401_v29 = vpack.c.b16 %v1400_v27, %v1399_v26 }
 0x512   : > { %1452 = vmatpush.bf16.msra.mxu0 %v2004_v56 }
 0x516   : > { %1453 = vmatpush.bf16.msra.mxu0 %v2003_v22 }
 0x51a   : > { %1454 = vmatpush.bf16.msra.mxu0 %v2002_v10 }
 0x51e   : > { %1455 = vmatpush.bf16.msra.mxu0 %v2001_v23 }
 0x522   : > { %1456 = vmatpush.bf16.msra.mxu0 %v2000_v24 }
 0x526   : > { %1457 = vmatpush.bf16.msra.mxu0 %v1999_v11 }
 0x52a   : > { %1458 = vmatpush.bf16.msra.mxu0 %v1998_v28 }
 0x52d   : > { %1459 = vmatmul.bf16.vlgmr.msra.gmra.mxu0 %v1401_v29 }
 0x5aa   : > { %v1460_v31 = vpop.f32.mrf.mxu0 }
 0x5ab   : > { %v1461_v32 = vadd.f32 %v2092_v30, %v1460_v31 }
 0x5ad   : > { %1465 = vst [vmem:[%s2697_s21] sm:$0xff] %v1461_v32 }
 0x5b2   : > { %v1462_v33 = vpop.f32.mrf.mxu0 }
 0x5b3   : > { %v1463_v34 = vadd.f32 %v2092_v30, %v1462_v33 }
 0x5b5   : > { %1466 = vst [vmem:[%s2697_s21 + $0x8] sm:$0xff] %v1463_v34 }
 0x5b6 PF: > { %p2030_p4 = scmp.eq.s32.totalorder %s2328_s17, 1  ;;  %s2231_s14 = smov [#allocation9]  }
 0x5b7   : > { %s1475_s22 = sshll.u32 %s2231_s14, 4  ;;  %s2698_s18 = sld [smem:[#allocation18_spill]]  ;;  %s1476_s22 = int_to_ptr.vmem [resolvable:$true] %s1475_s22 }
 0x5b8   : > { %s2232_s28 = smov 128   ;;  %s2233_s29 = smov 8  }
 0x5bd   : > { %s1477_s27 = sshll.u32 %s2698_s18, 4  ;;  %s1478_s27 = int_to_ptr.hbm [resolvable:$true] %s1477_s27 }
 0x5be   : > { %2016 = dma.vmem_to_hbm [thread:$0]  (%p2030_p4), %s1476_s22, 256, %s1478_s27, [#allocation6], %s2232_s28, %s2232_s28, %s2233_s29  }
 0x5bf   : > { %2206 = dma.done.wait (%p2030_p4), [#allocation6], 256  }
 0x5c0   : > { %2208 = vsyncadd (%p2030_p4), [#allocation6], 4294967040 }
 0x5c1 PF: > { %s2699_s12 = sld [smem:[#allocation13_spill]]  ;;  %p27_p5 = scmp.ge.s32.totalorder %s2353_s25, 4  }
 0x5c2   : > { %s2700_s15 = sld [smem:[#allocation14_spill]]  ;;  %s2701_s29 = smov %s2215_s30 }
 0x5c3   : > { %s2703_s16 = smov %s2353_s25  ;;  %29 = sbr.rel (!%p27_p5) target bundleno = 10 (0xa), region = 134 }
 0x5c7   : > { %s2702_s30 = smov %s2699_s12 }
 0x5c8   :  { %1497 = vsyncpa [#allocation5], 1 }
 0x5c9   :  { %1499 = vsyncpa [#allocation5 + $0x1], 1 }
 0x5ca   :  { %1500 = vsyncpa [#allocation8], 1 }
 0x5cb   :  { %1501 = vsyncpa [#allocation6], 1 }
 0x5cc   :  { %1503 = vsyncpa [#allocation6 + $0x1], 1 }

</bundles_post_ra>
